<compile_context>
chip_gen: v5e
topology: v5e:2x2
jax: 0.10.0
libtpu: 0.0.40
codegen_flags: <defaults>
</compile_context>

<pallas_src>
import functools

import jax
import jax.numpy as jnp
from jax.experimental import pallas as pl
from jax.experimental.pallas import tpu as pltpu

A_DIM = 6
S_LEN = 8          # time length implied by out_layer = Linear(128*6, ...)
S_INFO = 6         # number of state channels used by forward()
H = 128
N1 = 14 * H        # 1792 : fused stage-1 output width
N2 = 2 * H         # 256  : fused stage-2 output width  ([s2|s3])


# --------------------------------------------------------------------------
# Pallas kernel: whole forward for one batch tile.
#   x_ref  : [TM, 48]      flattened state tile
#   w1_ref : [48, 1792]    stage-1 Toeplitz weight
#   w2_ref : [1280, 256]   stage-2 block-diagonal weight
#   w3_ref : [768, 128]    out_layer first Linear (rows pre-permuted)
#   b_ref  : [8, 1792]     packed biases + final-layer vector/scalar
#   out_ref: [TM, 1]
# --------------------------------------------------------------------------
def critic_kernel(x_ref, w1_ref, w2_ref, w3_ref, b_ref, out_ref):
    relu = lambda v: jnp.maximum(v, 0.0)
    xf = x_ref[...]                                                # [TM, 48]

    # Stage 1: fc1/fc2/fc3 + both first convs + conv3 -> one matmul.
    y1 = jnp.dot(xf.astype(w1_ref.dtype), w1_ref[...],
                 preferred_element_type=jnp.float32) + b_ref[0:1, :]        # [TM, 1792]

    head = relu(y1[:, 0:4 * H])        # [s0 | s1 | s5 | s4]                 [TM, 512]
    taps = y1[:, 4 * H:N1]             # first-conv taps of both branches    [TM, 1280]

    # Stage 2: both second-layer convs -> one block-diagonal matmul.
    y2 = jnp.dot(taps.astype(w2_ref.dtype), w2_ref[...],
                 preferred_element_type=jnp.float32) + b_ref[1:2, 0:N2]     # [TM, 256]
    s23 = relu(y2)                     # [s2 | s3]

    # Output MLP (w3 rows pre-permuted to the [s0,s1,s5,s4,s2,s3] merge order).
    merged = jnp.concatenate([head, s23], axis=1)                           # [TM, 768]
    h = relu(jnp.dot(merged.astype(w3_ref.dtype), w3_ref[...],
                     preferred_element_type=jnp.float32) + b_ref[2:3, 0:H]) # [TM, 128]

    # Final Linear(128, 1): VPU multiply + lane reduction (no N=1 MXU push).
    out_ref[...] = (jnp.sum(h * b_ref[3:4, 0:H], axis=-1, keepdims=True)
                    + b_ref[4:5, 0:1])


# --------------------------------------------------------------------------
# Parameter init (PyTorch layouts) and packing into lane-aligned slabs.
# --------------------------------------------------------------------------
def init_params(key):
    ks = jax.random.split(key, 20)
    n = lambda k, shape: (0.1 * jax.random.normal(k, shape)).astype(jnp.float32)
    return dict(
        fc1_w=n(ks[0], (H, 1)),        fc1_b=n(ks[1], (H,)),
        fc2_w=n(ks[2], (H, 1)),        fc2_b=n(ks[3], (H,)),
        fc3_w=n(ks[4], (H, 1)),        fc3_b=n(ks[5], (H,)),
        c1a_w=n(ks[6], (H, 1, 4)),     c1a_b=n(ks[7], (H,)),
        c1b_w=n(ks[8], (H, H, 5)),     c1b_b=n(ks[9], (H,)),
        c2a_w=n(ks[10], (H, 1, 4)),    c2a_b=n(ks[11], (H,)),
        c2b_w=n(ks[12], (H, H, 5)),    c2b_b=n(ks[13], (H,)),
        c3_w=n(ks[14], (H, 1, A_DIM)), c3_b=n(ks[15], (H,)),
        o1_w=n(ks[16], (H, H * 6)),    o1_b=n(ks[17], (H,)),
        o2_w=n(ks[18], (1, H)),        o2_b=n(ks[19], (1,)),
    )


def pack_params(p, compute_dtype=jnp.float32):
    """Torch-layout params -> 4 packed, lane-aligned slabs for the kernel.

    Stage-1 column layout of W1 [48, 1792] (rows = flat state index c*8 + t):
        [0:128)    s0   (fc1 on x[:,0,7])
        [128:256)  s1   (fc2 on x[:,1,7])
        [256:384)  s5   (fc3 on x[:,5,7])
        [384:512)  s4   (conv3 k=6 on x[:,4,0:6])
        [512:1152) conv1 first-layer taps (tap-major, channel-minor)
        [1152:1792) conv2 first-layer taps
    """
    f32 = jnp.float32

    # ---- W1: stage-1 Toeplitz weight + its bias row -------------------------
    w1 = jnp.zeros((S_INFO * S_LEN, N1), f32)
    w1 = w1.at[0 * S_LEN + 7, 0 * H:1 * H].set(p["fc1_w"][:, 0])
    w1 = w1.at[1 * S_LEN + 7, 1 * H:2 * H].set(p["fc2_w"][:, 0])
    w1 = w1.at[5 * S_LEN + 7, 2 * H:3 * H].set(p["fc3_w"][:, 0])
    for k in range(A_DIM):                                   # conv3, single tap
        w1 = w1.at[4 * S_LEN + k, 3 * H:4 * H].set(p["c3_w"][:, 0, k])
    for t in range(5):                                       # conv1 first layer (ch 2)
        for k in range(4):
            w1 = w1.at[2 * S_LEN + t + k, (4 + t) * H:(5 + t) * H].set(p["c1a_w"][:, 0, k])
    for t in range(5):                                       # conv2 first layer (ch 3)
        for k in range(4):
            w1 = w1.at[3 * S_LEN + t + k, (9 + t) * H:(10 + t) * H].set(p["c2a_w"][:, 0, k])

    b1 = jnp.concatenate([p["fc1_b"], p["fc2_b"], p["fc3_b"], p["c3_b"],
                          jnp.tile(p["c1a_b"], 5), jnp.tile(p["c2a_b"], 5)])   # [1792]

    # ---- W2: block-diagonal second-layer convs ------------------------------
    blk1 = jnp.transpose(p["c1b_w"], (2, 1, 0)).reshape(5 * H, H)   # row = tap*128 + c_in
    blk2 = jnp.transpose(p["c2b_w"], (2, 1, 0)).reshape(5 * H, H)
    w2 = jnp.zeros((10 * H, N2), f32)
    w2 = w2.at[0:5 * H, 0:H].set(blk1)
    w2 = w2.at[5 * H:10 * H, H:2 * H].set(blk2)
    b2 = jnp.concatenate([p["c1b_b"], p["c2b_b"]])                  # [256]

    # ---- W3: out_layer first Linear, rows permuted to [s0,s1,s5,s4,s2,s3] ---
    o1t = p["o1_w"].T                                               # [768, 128]
    perm = (0, 1, 5, 4, 2, 3)
    w3 = jnp.concatenate([o1t[j * H:(j + 1) * H] for j in perm], axis=0)

    # ---- bias slab: all biases + final-layer weights in one [8, 1792] -------
    bias = jnp.zeros((8, N1), f32)
    bias = bias.at[0, :].set(b1)
    bias = bias.at[1, 0:N2].set(b2)
    bias = bias.at[2, 0:H].set(p["o1_b"])
    bias = bias.at[3, 0:H].set(p["o2_w"][0, :])
    bias = bias.at[4, 0].set(p["o2_b"][0])

    # bf16 matmul operands are a 2-3x MXU win on v6e/v7x (keep bias/ReLU math f32).
    return (w1.astype(compute_dtype), w2.astype(compute_dtype),
            w3.astype(compute_dtype), bias)


# --------------------------------------------------------------------------
# Wrapper: batch-tiled pallas_call with resident weight slabs.
# --------------------------------------------------------------------------
@functools.partial(jax.jit, static_argnames=("compute_dtype",))
def critic_forward(x, params, compute_dtype=jnp.float32):
    B = x.shape[0]
    xf = x.reshape(B, S_INFO * S_LEN).astype(jnp.float32)            # [B, 48]
    w1, w2, w3, bias = pack_params(params, compute_dtype)

    # Batch tile: >=8 (f32 sublane), 128 for MXU-filling tiles at real batch sizes.
    tm = 128 if B >= 128 else max(8, ((B + 7) // 8) * 8)
    b_pad = ((B + tm - 1) // tm) * tm
    if b_pad != B:
        xf = jnp.pad(xf, ((0, b_pad - B), (0, 0)))

    out = pl.pallas_call(
        critic_kernel,
        out_shape=jax.ShapeDtypeStruct((b_pad, 1), jnp.float32),
        grid=(b_pad // tm,),
        in_specs=[
            pl.BlockSpec((tm, S_INFO * S_LEN), lambda i: (i, 0)),    # x tile
            pl.BlockSpec(w1.shape, lambda i: (0, 0)),                # resident weights
            pl.BlockSpec(w2.shape, lambda i: (0, 0)),
            pl.BlockSpec(w3.shape, lambda i: (0, 0)),
            pl.BlockSpec(bias.shape, lambda i: (0, 0)),
        ],
        out_specs=pl.BlockSpec((tm, 1), lambda i: (i, 0)),
        compiler_params=pltpu.CompilerParams(
            dimension_semantics=("parallel",)),                      # shards across v7x TCs
    )(xf, w1, w2, w3, bias)
    return out[:B]


# --------------------------------------------------------------------------
# Pure-JAX reference (direct translation of the PyTorch forward) for checking.
# --------------------------------------------------------------------------
def reference(x, p):
    relu = lambda v: jnp.maximum(v, 0.0)
    lin = lambda v, W, b: relu(v @ W.T + b)                # v:[B,1], W:[128,1]

    def conv1d(sig, W, b):                                 # sig:[B,Cin,L], W:[Cout,Cin,K]
        K, L = W.shape[2], sig.shape[2]
        cols = [jnp.einsum("bck,ock->bo", sig[:, :, t:t + K], W) + b
                for t in range(L - K + 1)]
        return jnp.stack(cols, axis=2)                     # [B,Cout,L-K+1]

    B = x.shape[0]
    s0 = lin(x[:, 0:1, -1], p["fc1_w"], p["fc1_b"])
    s1 = lin(x[:, 1:2, -1], p["fc2_w"], p["fc2_b"])
    s2 = relu(conv1d(conv1d(x[:, 2:3, :], p["c1a_w"], p["c1a_b"]),
                     p["c1b_w"], p["c1b_b"])).reshape(B, -1)
    s3 = relu(conv1d(conv1d(x[:, 3:4, :], p["c2a_w"], p["c2a_b"]),
                     p["c2b_w"], p["c2b_b"])).reshape(B, -1)
    s4 = relu(conv1d(x[:, 4:5, :A_DIM], p["c3_w"], p["c3_b"])).reshape(B, -1)
    s5 = lin(x[:, 5:6, -1], p["fc3_w"], p["fc3_b"])
    m = jnp.concatenate([s0, s1, s2, s3, s4, s5], axis=1)
    h = relu(m @ p["o1_w"].T + p["o1_b"])
    return h @ p["o2_w"].T + p["o2_b"]


if __name__ == "__main__":
    key = jax.random.PRNGKey(0)
    kx, kp = jax.random.split(key)
    B = 2
    x = jax.random.normal(kx, (B, S_INFO, S_LEN), dtype=jnp.float32)
    params = init_params(kp)

    out = critic_forward(x, params)
    jax.block_until_ready(out)

    with jax.default_matmul_precision("highest"):
        ref = reference(x, params)
    assert out.shape == (B, 1)
    assert jnp.allclose(out, ref, rtol=1e-3, atol=1e-3), (out, ref)

    print("KERNEL_OK")
</pallas_src>

<mosaic_0001>
module attributes {stable_mosaic.version = 11 : i64} {
  func.func @critic_kernel(%arg0: i32, %arg1: memref<8x48xf32, #tpu.memory_space<vmem>>, %arg2: memref<48x1792xf32, #tpu.memory_space<vmem>>, %arg3: memref<1280x256xf32, #tpu.memory_space<vmem>>, %arg4: memref<768x128xf32, #tpu.memory_space<vmem>>, %arg5: memref<8x1792xf32, #tpu.memory_space<vmem>>, %arg6: memref<8x1xf32, #tpu.memory_space<vmem>>) attributes {dimension_semantics = [#tpu.dimension_semantics<parallel>], iteration_bounds = array<i64: 1>, scalar_prefetch = 0 : i64, scratch_operands = 0 : i64, tpu.core_type = #tpu.core_type<tc>, window_params = [{transform_indices = @transform_0, window_bounds = array<i64: 8, 48>}, {pipeline_mode = #tpu.pipeline_mode<synchronous>, transform_indices = @transform_1, window_bounds = array<i64: 48, 1792>}, {pipeline_mode = #tpu.pipeline_mode<synchronous>, transform_indices = @transform_2, window_bounds = array<i64: 1280, 256>}, {pipeline_mode = #tpu.pipeline_mode<synchronous>, transform_indices = @transform_3, window_bounds = array<i64: 768, 128>}, {pipeline_mode = #tpu.pipeline_mode<synchronous>, transform_indices = @transform_4, window_bounds = array<i64: 8, 1792>}, {transform_indices = @transform_5, window_bounds = array<i64: 8, 1>}]} {
    %c0 = arith.constant 0 : index
    %c0_0 = arith.constant 0 : index
    %0 = vector.load %arg1[%c0, %c0_0] : memref<8x48xf32, #tpu.memory_space<vmem>>, vector<8x48xf32>
    %c0_1 = arith.constant 0 : index
    %c0_2 = arith.constant 0 : index
    %1 = vector.load %arg2[%c0_1, %c0_2] : memref<48x1792xf32, #tpu.memory_space<vmem>>, vector<48x1792xf32>
    %cst = arith.constant dense<0.000000e+00> : vector<8x1792xf32>
    %2 = tpu.matmul %0, %1, %cst {dimension_numbers = #tpu.dot_dimension_numbers<[1], [0], [0], [1], [0, 0, 1, 1], [], []>} : vector<8x48xf32>, vector<48x1792xf32>, vector<8x1792xf32> -> vector<8x1792xf32>
    %c0_3 = arith.constant 0 : index
    %c0_4 = arith.constant 0 : index
    %3 = vector.load %arg5[%c0_3, %c0_4] : memref<8x1792xf32, #tpu.memory_space<vmem>>, vector<1x1792xf32>
    %4 = vector.broadcast %3 : vector<1x1792xf32> to vector<8x1792xf32>
    %5 = arith.addf %2, %4 : vector<8x1792xf32>
    %6 = vector.extract_strided_slice %5 {offsets = [0, 0], sizes = [8, 512], strides = [1, 1]} : vector<8x1792xf32> to vector<8x512xf32>
    %cst_5 = arith.constant 0.000000e+00 : f32
    %7 = vector.broadcast %cst_5 : f32 to vector<8x512xf32>
    %8 = arith.maximumf %6, %7 : vector<8x512xf32>
    %9 = vector.extract_strided_slice %5 {offsets = [0, 512], sizes = [8, 1280], strides = [1, 1]} : vector<8x1792xf32> to vector<8x1280xf32>
    %c0_6 = arith.constant 0 : index
    %c0_7 = arith.constant 0 : index
    %10 = vector.load %arg3[%c0_6, %c0_7] : memref<1280x256xf32, #tpu.memory_space<vmem>>, vector<1280x256xf32>
    %cst_8 = arith.constant dense<0.000000e+00> : vector<8x256xf32>
    %11 = tpu.matmul %9, %10, %cst_8 {dimension_numbers = #tpu.dot_dimension_numbers<[1], [0], [0], [1], [0, 0, 1, 1], [], []>} : vector<8x1280xf32>, vector<1280x256xf32>, vector<8x256xf32> -> vector<8x256xf32>
    %c1 = arith.constant 1 : index
    %c0_9 = arith.constant 0 : index
    %12 = vector.load %arg5[%c1, %c0_9] : memref<8x1792xf32, #tpu.memory_space<vmem>>, vector<1x256xf32>
    %13 = vector.broadcast %12 : vector<1x256xf32> to vector<8x256xf32>
    %14 = arith.addf %11, %13 : vector<8x256xf32>
    %cst_10 = arith.constant 0.000000e+00 : f32
    %15 = vector.broadcast %cst_10 : f32 to vector<8x256xf32>
    %16 = arith.maximumf %14, %15 : vector<8x256xf32>
    %17 = tpu.concatenate %8, %16 in 1 : vector<8x512xf32>, vector<8x256xf32> -> vector<8x768xf32>
    %c0_11 = arith.constant 0 : index
    %c0_12 = arith.constant 0 : index
    %18 = vector.load %arg4[%c0_11, %c0_12] : memref<768x128xf32, #tpu.memory_space<vmem>>, vector<768x128xf32>
    %cst_13 = arith.constant dense<0.000000e+00> : vector<8x128xf32>
    %19 = tpu.matmul %17, %18, %cst_13 {dimension_numbers = #tpu.dot_dimension_numbers<[1], [0], [0], [1], [0, 0, 1, 1], [], []>} : vector<8x768xf32>, vector<768x128xf32>, vector<8x128xf32> -> vector<8x128xf32>
    %c2 = arith.constant 2 : index
    %c0_14 = arith.constant 0 : index
    %20 = vector.load %arg5[%c2, %c0_14] : memref<8x1792xf32, #tpu.memory_space<vmem>>, vector<1x128xf32>
    %21 = vector.broadcast %20 : vector<1x128xf32> to vector<8x128xf32>
    %22 = arith.addf %19, %21 : vector<8x128xf32>
    %cst_15 = arith.constant 0.000000e+00 : f32
    %23 = vector.broadcast %cst_15 : f32 to vector<8x128xf32>
    %24 = arith.maximumf %22, %23 : vector<8x128xf32>
    %c3 = arith.constant 3 : index
    %c0_16 = arith.constant 0 : index
    %25 = vector.load %arg5[%c3, %c0_16] : memref<8x1792xf32, #tpu.memory_space<vmem>>, vector<1x128xf32>
    %26 = vector.broadcast %25 : vector<1x128xf32> to vector<8x128xf32>
    %27 = arith.mulf %24, %26 : vector<8x128xf32>
    %cst_17 = arith.constant dense<0.000000e+00> : vector<8xf32>
    %28 = vector.multi_reduction <add>, %27, %cst_17 [1] : vector<8x128xf32> to vector<8xf32>
    %29 = vector.shape_cast %28 : vector<8xf32> to vector<8x1xf32>
    %c4 = arith.constant 4 : index
    %c0_18 = arith.constant 0 : index
    %30 = vector.load %arg5[%c4, %c0_18] : memref<8x1792xf32, #tpu.memory_space<vmem>>, vector<1x1xf32>
    %31 = vector.broadcast %30 : vector<1x1xf32> to vector<8x1xf32>
    %32 = arith.addf %29, %31 : vector<8x1xf32>
    %c0_19 = arith.constant 0 : index
    %c0_20 = arith.constant 0 : index
    %33 = vector.load %arg6[%c0_19, %c0_20] : memref<8x1xf32, #tpu.memory_space<vmem>>, vector<8x1xf32>
    tpu.vector_store %arg6[%c0_19, %c0_20], %32 {strides = array<i32>} : memref<8x1xf32, #tpu.memory_space<vmem>>, vector<8x1xf32>,
    return
  }
  func.func @transform_0(%arg0: i32) -> (i32, i32) {
    %c0_i32 = arith.constant 0 : i32
    %c0_i32_0 = arith.constant 0 : i32
    return %arg0, %c0_i32 : i32, i32
  }
  func.func @transform_1(%arg0: i32) -> (i32, i32) {
    %c0_i32 = arith.constant 0 : i32
    %c0_i32_0 = arith.constant 0 : i32
    %c0_i32_1 = arith.constant 0 : i32
    return %c0_i32, %c0_i32_0 : i32, i32
  }
  func.func @transform_2(%arg0: i32) -> (i32, i32) {
    %c0_i32 = arith.constant 0 : i32
    %c0_i32_0 = arith.constant 0 : i32
    %c0_i32_1 = arith.constant 0 : i32
    return %c0_i32, %c0_i32_0 : i32, i32
  }
  func.func @transform_3(%arg0: i32) -> (i32, i32) {
    %c0_i32 = arith.constant 0 : i32
    %c0_i32_0 = arith.constant 0 : i32
    %c0_i32_1 = arith.constant 0 : i32
    return %c0_i32, %c0_i32_0 : i32, i32
  }
  func.func @transform_4(%arg0: i32) -> (i32, i32) {
    %c0_i32 = arith.constant 0 : i32
    %c0_i32_0 = arith.constant 0 : i32
    %c0_i32_1 = arith.constant 0 : i32
    return %c0_i32, %c0_i32_0 : i32, i32
  }
  func.func @transform_5(%arg0: i32) -> (i32, i32) {
    %c0_i32 = arith.constant 0 : i32
    %c0_i32_0 = arith.constant 0 : i32
    return %arg0, %c0_i32 : i32, i32
  }
}

</mosaic_0001>

<bundles_post_ra>
// kernel: custom-call
= control target key start
LH: loop header
LB: loop body
LE: loop exit
PB: predicated region body
PF: predicated region fallthrough
CT: control target
= control target key end

     0   :  { %s6_s0 = inlined_call_operand.vmem [shape: f32[1792], index: 0, kind: output, shape index: {}]  }

// kernel: critic_forward.1
= control target key start
LH: loop header
LB: loop body
LE: loop exit
PB: predicated region body
PF: predicated region fallthrough
CT: control target
= control target key end

     0   :  { %vm142_vm0 = vcmask 392192   ;;  %vm1383_vm1 = vcmask 7168   ;;  %s3060_s1 = inlined_call_operand.vmem [shape: f32[48,1792], index: 1, kind: input, shape index: {}]   ;;  %s3061_s0 = inlined_call_operand.vmem [shape: f32[8,48], index: 0, kind: input, shape index: {}]   ;;  %s3062_s2 = inlined_call_operand.vmem [shape: f32[1280,256], index: 2, kind: input, shape index: {}]   ;;  %s3063_s4 = inlined_call_operand.vmem [shape: f32[8,1792], index: 4, kind: input, shape index: {}]   ;;  %s3064_s3 = inlined_call_operand.vmem [shape: f32[768,128], index: 3, kind: input, shape index: {}]   ;;  %s3065_s5 = inlined_call_operand.vmem [shape: f32[8,1], index: 5, kind: output, shape index: {}]  }
   0x1   :  { %v91_v0 = vld [vmem:[%s3060_s1 + $0x230] sm:$0xff]  ;;  %v92_v1 = vld [vmem:[%s3060_s1 + $0x238] sm:$0xff]  ;;  %v97_v2 = vld [vmem:[%s3060_s1 + $0x260] sm:$0xff] }
   0x2   :  { %156 = vmatpush.msra.mxu0 %v91_v0  ;;  %176 = vmatpush.msra.mxu1 %v92_v1  ;;  %v98_v3 = vld [vmem:[%s3060_s1 + $0x268] sm:$0xff]  ;;  %v77_v4 = vld [vmem:[%s3060_s1 + $0x1c0] sm:$0xff]  ;;  %v83_v6 = vld [vmem:[%s3060_s1 + $0x1f0] sm:$0xff] }
   0x3   :  { %v78_v5 = vld [vmem:[%s3060_s1 + $0x1c8] sm:$0xff]  ;;  %276 = vmatpush.msra.mxu2 %v97_v2  ;;  %296 = vmatpush.msra.mxu3 %v98_v3  ;;  %v84_v7 = vld [vmem:[%s3060_s1 + $0x1f8] sm:$0xff]  ;;  %v63_v8 = vld [vmem:[%s3060_s1 + $0x150] sm:$0xff] }
   0x4   :  { %157 = vmatpush.msra.mxu0 %v77_v4  ;;  %177 = vmatpush.msra.mxu1 %v78_v5  ;;  %v64_v9 = vld [vmem:[%s3060_s1 + $0x158] sm:$0xff]  ;;  %v69_v10 = vld [vmem:[%s3060_s1 + $0x180] sm:$0xff]  ;;  %v70_v11 = vld [vmem:[%s3060_s1 + $0x188] sm:$0xff] }
   0x5   :  { %277 = vmatpush.msra.mxu2 %v83_v6  ;;  %297 = vmatpush.msra.mxu3 %v84_v7  ;;  %v49_v12 = vld [vmem:[%s3060_s1 + $0xe0] sm:$0xff]  ;;  %v50_v13 = vld [vmem:[%s3060_s1 + $0xe8] sm:$0xff]  ;;  %v55_v14 = vld [vmem:[%s3060_s1 + $0x110] sm:$0xff] }
   0x6   :  { %158 = vmatpush.msra.mxu0 %v63_v8  ;;  %178 = vmatpush.msra.mxu1 %v64_v9  ;;  %v56_v15 = vld [vmem:[%s3060_s1 + $0x118] sm:$0xff]  ;;  %v35_v16 = vld [vmem:[%s3060_s1 + $0x70] sm:$0xff]  ;;  %v41_v18 = vld [vmem:[%s3060_s1 + $0xa0] sm:$0xff] }
   0x7   :  { %278 = vmatpush.msra.mxu2 %v69_v10  ;;  %298 = vmatpush.msra.mxu3 %v70_v11  ;;  %v36_v17 = vld [vmem:[%s3060_s1 + $0x78] sm:$0xff]  ;;  %v42_v19 = vld [vmem:[%s3060_s1 + $0xa8] sm:$0xff]  ;;  %v21_v20 = vld [vmem:[%s3060_s1] sm:$0xff] }
   0x8   :  { %159 = vmatpush.msra.mxu0 %v49_v12  ;;  %179 = vmatpush.msra.mxu1 %v50_v13  ;;  %v22_v21 = vld [vmem:[%s3060_s1 + $0x8] sm:$0xff]  ;;  %v27_v22 = vld [vmem:[%s3060_s1 + $0x30] sm:$0xff]  ;;  %v28_v23 = vld [vmem:[%s3060_s1 + $0x38] sm:$0xff] }
   0x9   :  { %279 = vmatpush.msra.mxu2 %v55_v14  ;;  %299 = vmatpush.msra.mxu3 %v56_v15  ;;  %v93_v24 = vld [vmem:[%s3060_s1 + $0x240] sm:$0xff]  ;;  %v94_v25 = vld [vmem:[%s3060_s1 + $0x248] sm:$0xff]  ;;  %v79_v27 = vld [vmem:[%s3060_s1 + $0x1d0] sm:$0xff] }
   0xa   :  { %160 = vmatpush.msra.mxu0 %v35_v16  ;;  %180 = vmatpush.msra.mxu1 %v36_v17  ;;  %v1517_v26 = vld [vmem:[%s3061_s0] sm:$0xff]  ;;  %v80_v28 = vld [vmem:[%s3060_s1 + $0x1d8] sm:$0xff]  ;;  %v66_v30 = vld [vmem:[%s3060_s1 + $0x168] sm:$0xff] }
   0xb   :  { %280 = vmatpush.msra.mxu2 %v41_v18  ;;  %300 = vmatpush.msra.mxu3 %v42_v19  ;;  %v65_v29 = vld [vmem:[%s3060_s1 + $0x160] sm:$0xff]  ;;  %v102_v32 = vld [vmem:[%s3060_s1 + $0x288] sm:$0xff]  ;;  %v51_v33 = vld [vmem:[%s3060_s1 + $0xf0] sm:$0xff] }
   0xc   :  { %161 = vmatpush.msra.mxu0 %v21_v20  ;;  %181 = vmatpush.msra.mxu1 %v22_v21  ;;  %v101_v31 = vld [vmem:[%s3060_s1 + $0x280] sm:$0xff]  ;;  %v52_v34 = vld [vmem:[%s3060_s1 + $0xf8] sm:$0xff]  ;;  %v87_v35 = vld [vmem:[%s3060_s1 + $0x210] sm:$0xff] }
   0xd   :  { %281 = vmatpush.msra.mxu2 %v27_v22  ;;  %301 = vmatpush.msra.mxu3 %v28_v23  ;;  %v88_v36 = vld [vmem:[%s3060_s1 + $0x218] sm:$0xff]  ;;  %v37_v37 = vld [vmem:[%s3060_s1 + $0x80] sm:$0xff]  ;;  %v38_v38 = vld [vmem:[%s3060_s1 + $0x88] sm:$0xff] }
   0xe   :  { %196 = vmatpush.msrb.mxu0 %v93_v24  ;;  %216 = vmatpush.msrb.mxu1 %v94_v25  ;;  %v73_v39 = vld [vmem:[%s3060_s1 + $0x1a0] sm:$0xff]  ;;  %v74_v40 = vld [vmem:[%s3060_s1 + $0x1a8] sm:$0xff]  ;;  %v23_v41 = vld [vmem:[%s3060_s1 + $0x10] sm:$0xff] }
   0xf   :  { %1397 = vmatmul.msk.f32.vlgmr.msra.gmra.mxu2 %vm142_vm0, %v1517_v26  ;;  %1398 = vmatmul.msk.f32.vlgmr.msra.gmra.mxu3 %vm142_vm0, %v1517_v26  ;;  %v24_v42 = vld [vmem:[%s3060_s1 + $0x18] sm:$0xff]  ;;  %v95_v43 = vld [vmem:[%s3060_s1 + $0x250] sm:$0xff]  ;;  %v81_v45 = vld [vmem:[%s3060_s1 + $0x1e0] sm:$0xff] }
  0x10   :  { %197 = vmatpush.msrb.mxu0 %v79_v27  ;;  %217 = vmatpush.msrb.mxu1 %v80_v28  ;;  %v96_v44 = vld [vmem:[%s3060_s1 + $0x258] sm:$0xff]  ;;  %v82_v46 = vld [vmem:[%s3060_s1 + $0x1e8] sm:$0xff]  ;;  %v59_v47 = vld [vmem:[%s3060_s1 + $0x130] sm:$0xff] }
  0x11   :  { %1391 = vmatmul.msk.f32.vlgmr.msra.gmra.mxu0 %vm142_vm0, %v1517_v26  ;;  %1392 = vmatmul.msk.f32.vlgmr.msra.gmra.mxu1 %vm142_vm0, %v1517_v26  ;;  %v60_v48 = vld [vmem:[%s3060_s1 + $0x138] sm:$0xff]  ;;  %v67_v49 = vld [vmem:[%s3060_s1 + $0x170] sm:$0xff]  ;;  %v45_v51 = vld [vmem:[%s3060_s1 + $0xc0] sm:$0xff] }
  0x12   :  { %198 = vmatpush.msrb.mxu0 %v65_v29  ;;  %218 = vmatpush.msrb.mxu1 %v66_v30  ;;  %v68_v50 = vld [vmem:[%s3060_s1 + $0x178] sm:$0xff]  ;;  %v46_v52 = vld [vmem:[%s3060_s1 + $0xc8] sm:$0xff]  ;;  %v53_v53 = vld [vmem:[%s3060_s1 + $0x100] sm:$0xff] }
  0x13   :  { %356 = vmatpush.msrb.mxu2 %v101_v31  ;;  %376 = vmatpush.msrb.mxu3 %v102_v32  ;;  %v54_v54 = vld [vmem:[%s3060_s1 + $0x108] sm:$0xff]  ;;  %v31_v55 = vld [vmem:[%s3060_s1 + $0x50] sm:$0xff]  ;;  %v32_v56 = vld [vmem:[%s3060_s1 + $0x58] sm:$0xff] }
  0x14   :  { %199 = vmatpush.msrb.mxu0 %v51_v33  ;;  %219 = vmatpush.msrb.mxu1 %v52_v34  ;;  %v39_v57 = vld [vmem:[%s3060_s1 + $0x90] sm:$0xff]  ;;  %v40_v58 = vld [vmem:[%s3060_s1 + $0x98] sm:$0xff]  ;;  %v25_v59 = vld [vmem:[%s3060_s1 + $0x20] sm:$0xff] }
  0x15   :  { %357 = vmatpush.msrb.mxu2 %v87_v35  ;;  %377 = vmatpush.msrb.mxu3 %v88_v36  ;;  %v26_v60 = vld [vmem:[%s3060_s1 + $0x28] sm:$0xff]  ;;  %v99_v61 = vld [vmem:[%s3060_s1 + $0x270] sm:$0xff]  ;;  %v100_v62 = vld [vmem:[%s3060_s1 + $0x278] sm:$0xff] }
  0x16   :  { %200 = vmatpush.msrb.mxu0 %v37_v37  ;;  %220 = vmatpush.msrb.mxu1 %v38_v38  ;;  %v85_v63 = vld [vmem:[%s3060_s1 + $0x200] sm:$0xff]  ;;  %v86_v0 = vld [vmem:[%s3060_s1 + $0x208] sm:$0xff]  ;;  %v71_v1 = vld [vmem:[%s3060_s1 + $0x190] sm:$0xff] }
  0x17   :  { %358 = vmatpush.msrb.mxu2 %v73_v39  ;;  %378 = vmatpush.msrb.mxu3 %v74_v40  ;;  %v72_v2 = vld [vmem:[%s3060_s1 + $0x198] sm:$0xff]  ;;  %v57_v3 = vld [vmem:[%s3060_s1 + $0x120] sm:$0xff]  ;;  %v58_v4 = vld [vmem:[%s3060_s1 + $0x128] sm:$0xff] }
  0x18   :  { %201 = vmatpush.msrb.mxu0 %v23_v41  ;;  %221 = vmatpush.msrb.mxu1 %v24_v42  ;;  %v43_v5 = vld [vmem:[%s3060_s1 + $0xb0] sm:$0xff]  ;;  %v44_v6 = vld [vmem:[%s3060_s1 + $0xb8] sm:$0xff]  ;;  %v29_v9 = vld [vmem:[%s3060_s1 + $0x40] sm:$0xff] }
  0x19   :  { %1393 = vmatmul.msk.f32.vlgmr.msrb.gmra.mxu0 %vm142_vm0, %v1517_v26  ;;  %1394 = vmatmul.msk.f32.vlgmr.msrb.gmra.mxu1 %vm142_vm0, %v1517_v26  ;;  %v460_v7 = vld [vmem:[%s3062_s2 + $0xf0] sm:$0xff]  ;;  %v30_v10 = vld [vmem:[%s3060_s1 + $0x48] sm:$0xff]  ;;  %v458_v11 = vld [vmem:[%s3062_s2 + $0xe0] sm:$0xff] }
  0x1a   :  { %236 = vmatpush.msra.mxu0 %v95_v43  ;;  %256 = vmatpush.msra.mxu1 %v96_v44  ;;  %v492_v8 = vld [vmem:[%s3062_s2 + $0x1f0] sm:$0xff]  ;;  %v490_v12 = vld [vmem:[%s3062_s2 + $0x1e0] sm:$0xff]  ;;  %v104_v14 = vld [vmem:[%s3060_s1 + $0x298] sm:$0xff] }
  0x1b   :  { %359 = vmatpush.msrb.mxu2 %v59_v47  ;;  %379 = vmatpush.msrb.mxu3 %v60_v48  ;;  %v103_v13 = vld [vmem:[%s3060_s1 + $0x290] sm:$0xff]  ;;  %v89_v17 = vld [vmem:[%s3060_s1 + $0x220] sm:$0xff]  ;;  %v90_v18 = vld [vmem:[%s3060_s1 + $0x228] sm:$0xff] }
  0x1c   :  { %237 = vmatpush.msra.mxu0 %v81_v45  ;;  %257 = vmatpush.msra.mxu1 %v82_v46  ;;  %v456_v15 = vld [vmem:[%s3062_s2 + $0xd0] sm:$0xff]  ;;  %v454_v19 = vld [vmem:[%s3062_s2 + $0xc0] sm:$0xff]  ;;  %v76_v22 = vld [vmem:[%s3060_s1 + $0x1b8] sm:$0xff] }
  0x1d   :  { %360 = vmatpush.msrb.mxu2 %v45_v51  ;;  %380 = vmatpush.msrb.mxu3 %v46_v52  ;;  %v488_v16 = vld [vmem:[%s3062_s2 + $0x1d0] sm:$0xff]  ;;  %v486_v20 = vld [vmem:[%s3062_s2 + $0x1c0] sm:$0xff]  ;;  %v62_v27 = vld [vmem:[%s3060_s1 + $0x148] sm:$0xff] }
  0x1e   :  { %238 = vmatpush.msra.mxu0 %v67_v49  ;;  %258 = vmatpush.msra.mxu1 %v68_v50  ;;  %v75_v21 = vld [vmem:[%s3060_s1 + $0x1b0] sm:$0xff]  ;;  %v61_v25 = vld [vmem:[%s3060_s1 + $0x140] sm:$0xff]  ;;  %v48_v31 = vld [vmem:[%s3060_s1 + $0xd8] sm:$0xff] }
  0x1f   :  { %361 = vmatpush.msrb.mxu2 %v31_v55  ;;  %381 = vmatpush.msrb.mxu3 %v32_v56  ;;  %v452_v23 = vld [vmem:[%s3062_s2 + $0xb0] sm:$0xff]  ;;  %v450_v28 = vld [vmem:[%s3062_s2 + $0xa0] sm:$0xff]  ;;  %v34_v35 = vld [vmem:[%s3060_s1 + $0x68] sm:$0xff] }
  0x20   :  { %239 = vmatpush.msra.mxu0 %v53_v53  ;;  %259 = vmatpush.msra.mxu1 %v54_v54  ;;  %v484_v24 = vld [vmem:[%s3062_s2 + $0x1b0] sm:$0xff]  ;;  %v482_v29 = vld [vmem:[%s3062_s2 + $0x1a0] sm:$0xff] }
  0x21   :  { %1401 = vmatmul.msk.f32.vlgmr.msrb.gmra.mxu2 %vm142_vm0, %v1517_v26  ;;  %1402 = vmatmul.msk.f32.vlgmr.msrb.gmra.mxu3 %vm142_vm0, %v1517_v26  ;;  %v47_v30 = vld [vmem:[%s3060_s1 + $0xd0] sm:$0xff]  ;;  %v33_v34 = vld [vmem:[%s3060_s1 + $0x60] sm:$0xff] }
  0x22   :  { %240 = vmatpush.msra.mxu0 %v39_v57  ;;  %260 = vmatpush.msra.mxu1 %v40_v58  ;;  %v448_v32 = vld [vmem:[%s3062_s2 + $0x90] sm:$0xff]  ;;  %v446_v38 = vld [vmem:[%s3062_s2 + $0x80] sm:$0xff] }
  0x23   :  { %757 = vmatpush.msra.mxu2 %v460_v7  ;;  %777 = vmatpush.msra.mxu3 %v492_v8  ;;  %v480_v33 = vld [vmem:[%s3062_s2 + $0x190] sm:$0xff]  ;;  %v478_v39 = vld [vmem:[%s3062_s2 + $0x180] sm:$0xff] }
  0x24   :  { %241 = vmatpush.msra.mxu0 %v25_v59  ;;  %261 = vmatpush.msra.mxu1 %v26_v60  ;;  %v524_v36 = vld [vmem:[%s3062_s2 + $0x2f0] sm:$0xff]  ;;  %v522_v40 = vld [vmem:[%s3062_s2 + $0x2e0] sm:$0xff] }
  0x25   :  { %1395 = vmatmul.msk.f32.vlgmr.msra.gmra.mxu0 %vm142_vm0, %v1517_v26  ;;  %1396 = vmatmul.msk.f32.vlgmr.msra.gmra.mxu1 %vm142_vm0, %v1517_v26  ;;  %v556_v37 = vld [vmem:[%s3062_s2 + $0x3f0] sm:$0xff]  ;;  %v554_v41 = vld [vmem:[%s3062_s2 + $0x3e0] sm:$0xff] }
  0x26   :  { %316 = vmatpush.msrb.mxu0 %v99_v61  ;;  %336 = vmatpush.msrb.mxu1 %v100_v62  ;;  %v444_v42 = vld [vmem:[%s3062_s2 + $0x70] sm:$0xff]  ;;  %v442_v45 = vld [vmem:[%s3062_s2 + $0x60] sm:$0xff] }
  0x27   :  { %758 = vmatpush.msra.mxu2 %v458_v11  ;;  %778 = vmatpush.msra.mxu3 %v490_v12  ;;  %v476_v43 = vld [vmem:[%s3062_s2 + $0x170] sm:$0xff]  ;;  %v474_v46 = vld [vmem:[%s3062_s2 + $0x160] sm:$0xff] }
  0x28   :  { %317 = vmatpush.msrb.mxu0 %v85_v63  ;;  %337 = vmatpush.msrb.mxu1 %v86_v0  ;;  %v552_v44 = vld [vmem:[%s3062_s2 + $0x3d0] sm:$0xff]  ;;  %v518_v47 = vld [vmem:[%s3062_s2 + $0x2c0] sm:$0xff] }
  0x29   :  { %759 = vmatpush.msra.mxu2 %v456_v15  ;;  %779 = vmatpush.msra.mxu3 %v488_v16  ;;  %v550_v48 = vld [vmem:[%s3062_s2 + $0x3c0] sm:$0xff]  ;;  %v440_v49 = vld [vmem:[%s3062_s2 + $0x50] sm:$0xff] }
  0x2a   :  { %318 = vmatpush.msrb.mxu0 %v71_v1  ;;  %338 = vmatpush.msrb.mxu1 %v72_v2  ;;  %v472_v50 = vld [vmem:[%s3062_s2 + $0x150] sm:$0xff]  ;;  %v438_v53 = vld [vmem:[%s3062_s2 + $0x40] sm:$0xff] }
  0x2b   :  { %760 = vmatpush.msra.mxu2 %v454_v19  ;;  %780 = vmatpush.msra.mxu3 %v486_v20  ;;  %v516_v51 = vld [vmem:[%s3062_s2 + $0x2b0] sm:$0xff]  ;;  %v470_v54 = vld [vmem:[%s3062_s2 + $0x140] sm:$0xff] }
  0x2c   :  { %319 = vmatpush.msrb.mxu0 %v57_v3  ;;  %339 = vmatpush.msrb.mxu1 %v58_v4  ;;  %v548_v52 = vld [vmem:[%s3062_s2 + $0x3b0] sm:$0xff]  ;;  %v514_v55 = vld [vmem:[%s3062_s2 + $0x2a0] sm:$0xff] }
  0x2d   :  { %761 = vmatpush.msra.mxu2 %v452_v23  ;;  %781 = vmatpush.msra.mxu3 %v484_v24  ;;  %v546_v56 = vld [vmem:[%s3062_s2 + $0x3a0] sm:$0xff]  ;;  %v436_v57 = vld [vmem:[%s3062_s2 + $0x30] sm:$0xff] }
  0x2e   :  { %320 = vmatpush.msrb.mxu0 %v43_v5  ;;  %340 = vmatpush.msrb.mxu1 %v44_v6  ;;  %v468_v58 = vld [vmem:[%s3062_s2 + $0x130] sm:$0xff]  ;;  %v434_v61 = vld [vmem:[%s3062_s2 + $0x20] sm:$0xff] }
  0x2f   :  { %762 = vmatpush.msra.mxu2 %v450_v28  ;;  %782 = vmatpush.msra.mxu3 %v482_v29  ;;  %v512_v59 = vld [vmem:[%s3062_s2 + $0x290] sm:$0xff]  ;;  %v466_v62 = vld [vmem:[%s3062_s2 + $0x120] sm:$0xff] }
  0x30   :  { %321 = vmatpush.msrb.mxu0 %v29_v9  ;;  %341 = vmatpush.msrb.mxu1 %v30_v10  ;;  %v544_v60 = vld [vmem:[%s3062_s2 + $0x390] sm:$0xff]  ;;  %v510_v63 = vld [vmem:[%s3062_s2 + $0x280] sm:$0xff] }
  0x31   :  { %1399 = vmatmul.msk.f32.vlgmr.msrb.gmra.mxu0 %vm142_vm0, %v1517_v26  ;;  %1400 = vmatmul.msk.f32.vlgmr.msrb.gmra.mxu1 %vm142_vm0, %v1517_v26  ;;  %v542_v0 = vld [vmem:[%s3062_s2 + $0x380] sm:$0xff]  ;;  %v432_v1 = vld [vmem:[%s3062_s2 + $0x10] sm:$0xff] }
  0x32   :  { %396 = vmatpush.msra.mxu0 %v103_v13  ;;  %416 = vmatpush.msra.mxu1 %v104_v14  ;;  %v464_v2 = vld [vmem:[%s3062_s2 + $0x110] sm:$0xff]  ;;  %v430_v5 = vld [vmem:[%s3062_s2] sm:$0xff] }
  0x33   :  { %763 = vmatpush.msra.mxu2 %v448_v32  ;;  %783 = vmatpush.msra.mxu3 %v480_v33  ;;  %v508_v3 = vld [vmem:[%s3062_s2 + $0x270] sm:$0xff]  ;;  %v462_v6 = vld [vmem:[%s3062_s2 + $0x100] sm:$0xff] }
  0x34   :  { %397 = vmatpush.msra.mxu0 %v89_v17  ;;  %417 = vmatpush.msra.mxu1 %v90_v18  ;;  %v540_v4 = vld [vmem:[%s3062_s2 + $0x370] sm:$0xff]  ;;  %v506_v7 = vld [vmem:[%s3062_s2 + $0x260] sm:$0xff] }
  0x35   :  { %764 = vmatpush.msra.mxu2 %v446_v38  ;;  %784 = vmatpush.msra.mxu3 %v478_v39  ;;  %v538_v8 = vld [vmem:[%s3062_s2 + $0x360] sm:$0xff]  ;;  %v588_v9 = vld [vmem:[%s3062_s2 + $0x4f0] sm:$0xff] }
  0x36   :  { %398 = vmatpush.msra.mxu0 %v75_v21  ;;  %418 = vmatpush.msra.mxu1 %v76_v22  ;;  %v620_v10 = vld [vmem:[%s3062_s2 + $0x5f0] sm:$0xff]  ;;  %v586_v13 = vld [vmem:[%s3062_s2 + $0x4e0] sm:$0xff] }
  0x37   :  { %765 = vmatpush.msra.mxu2 %v444_v42  ;;  %785 = vmatpush.msra.mxu3 %v476_v43  ;;  %v504_v11 = vld [vmem:[%s3062_s2 + $0x250] sm:$0xff]  ;;  %v618_v14 = vld [vmem:[%s3062_s2 + $0x5e0] sm:$0xff] }
  0x38   :  { %399 = vmatpush.msra.mxu0 %v61_v25  ;;  %419 = vmatpush.msra.mxu1 %v62_v27  ;;  %v536_v12 = vld [vmem:[%s3062_s2 + $0x350] sm:$0xff]  ;;  %v502_v15 = vld [vmem:[%s3062_s2 + $0x240] sm:$0xff] }
  0x39   :  { %766 = vmatpush.msra.mxu2 %v442_v45  ;;  %786 = vmatpush.msra.mxu3 %v474_v46  ;;  %v534_v16 = vld [vmem:[%s3062_s2 + $0x340] sm:$0xff]  ;;  %v584_v17 = vld [vmem:[%s3062_s2 + $0x4d0] sm:$0xff] }
  0x3a   :  { %400 = vmatpush.msra.mxu0 %v47_v30  ;;  %420 = vmatpush.msra.mxu1 %v48_v31  ;;  %v616_v18 = vld [vmem:[%s3062_s2 + $0x5d0] sm:$0xff]  ;;  %v582_v21 = vld [vmem:[%s3062_s2 + $0x4c0] sm:$0xff] }
  0x3b   :  { %767 = vmatpush.msra.mxu2 %v440_v49  ;;  %787 = vmatpush.msra.mxu3 %v472_v50  ;;  %v500_v19 = vld [vmem:[%s3062_s2 + $0x230] sm:$0xff]  ;;  %v614_v22 = vld [vmem:[%s3062_s2 + $0x5c0] sm:$0xff] }
  0x3c   :  { %401 = vmatpush.msra.mxu0 %v33_v34  ;;  %421 = vmatpush.msra.mxu1 %v34_v35  ;;  %v532_v20 = vld [vmem:[%s3062_s2 + $0x330] sm:$0xff]  ;;  %v498_v23 = vld [vmem:[%s3062_s2 + $0x220] sm:$0xff] }
  0x3d   :  { %1403 = vmatmul.msk.f32.vlgmr.msra.gmra.mxu0 %vm142_vm0, %v1517_v26  ;;  %1404 = vmatmul.msk.f32.vlgmr.msra.gmra.mxu1 %vm142_vm0, %v1517_v26  ;;  %v520_v26 = vld [vmem:[%s3062_s2 + $0x2d0] sm:$0xff]  ;;  %v530_v24 = vld [vmem:[%s3062_s2 + $0x320] sm:$0xff] }
  0x3e   :  { %797 = vmatpush.msrb.mxu0 %v524_v36  ;;  %817 = vmatpush.msrb.mxu1 %v556_v37  ;;  %v580_v25 = vld [vmem:[%s3062_s2 + $0x4b0] sm:$0xff]  ;;  %v578_v30 = vld [vmem:[%s3062_s2 + $0x4a0] sm:$0xff] }
  0x3f   :  { %768 = vmatpush.msra.mxu2 %v438_v53  ;;  %788 = vmatpush.msra.mxu3 %v470_v54  ;;  %v612_v27 = vld [vmem:[%s3062_s2 + $0x5b0] sm:$0xff]  ;;  %v610_v31 = vld [vmem:[%s3062_s2 + $0x5a0] sm:$0xff] }
  0x40   :  { %798 = vmatpush.msrb.mxu0 %v522_v40  ;;  %818 = vmatpush.msrb.mxu1 %v554_v41  ;;  %v496_v28 = vld [vmem:[%s3062_s2 + $0x210] sm:$0xff]  ;;  %v494_v32 = vld [vmem:[%s3062_s2 + $0x200] sm:$0xff] }
  0x41   :  { %769 = vmatpush.msra.mxu2 %v436_v57  ;;  %789 = vmatpush.msra.mxu3 %v468_v58  ;;  %v528_v29 = vld [vmem:[%s3062_s2 + $0x310] sm:$0xff]  ;;  %v526_v33 = vld [vmem:[%s3062_s2 + $0x300] sm:$0xff] }
  0x42   :  { %799 = vmatpush.msrb.mxu0 %v520_v26  ;;  %819 = vmatpush.msrb.mxu1 %v552_v44  ;;  %v652_v34 = vld [vmem:[%s3062_s2 + $0x6f0] sm:$0xff]  ;;  %v650_v36 = vld [vmem:[%s3062_s2 + $0x6e0] sm:$0xff] }
  0x43   :  { %770 = vmatpush.msra.mxu2 %v434_v61  ;;  %790 = vmatpush.msra.mxu3 %v466_v62  ;;  %v684_v35 = vld [vmem:[%s3062_s2 + $0x7f0] sm:$0xff]  ;;  %v682_v37 = vld [vmem:[%s3062_s2 + $0x7e0] sm:$0xff] }
  0x44   :  { %800 = vmatpush.msrb.mxu0 %v518_v47  ;;  %820 = vmatpush.msrb.mxu1 %v550_v48  ;;  %v648_v38 = vld [vmem:[%s3062_s2 + $0x6d0] sm:$0xff]  ;;  %v646_v40 = vld [vmem:[%s3062_s2 + $0x6c0] sm:$0xff] }
  0x45   :  { %771 = vmatpush.msra.mxu2 %v432_v1  ;;  %791 = vmatpush.msra.mxu3 %v464_v2  ;;  %v680_v39 = vld [vmem:[%s3062_s2 + $0x7d0] sm:$0xff]  ;;  %v678_v41 = vld [vmem:[%s3062_s2 + $0x7c0] sm:$0xff] }
  0x46   :  { %801 = vmatpush.msrb.mxu0 %v516_v51  ;;  %821 = vmatpush.msrb.mxu1 %v548_v52  ;;  %v644_v42 = vld [vmem:[%s3062_s2 + $0x6b0] sm:$0xff]  ;;  %v642_v26 = vld [vmem:[%s3062_s2 + $0x6a0] sm:$0xff] }
  0x47   :  { %772 = vmatpush.msra.mxu2 %v430_v5  ;;  %792 = vmatpush.msra.mxu3 %v462_v6  ;;  %v676_v43 = vld [vmem:[%s3062_s2 + $0x7b0] sm:$0xff]  ;;  %v674_v44 = vld [vmem:[%s3062_s2 + $0x7a0] sm:$0xff] }
  0x48   :  { %802 = vmatpush.msrb.mxu0 %v514_v55  ;;  %822 = vmatpush.msrb.mxu1 %v546_v56  ;;  %v640_v45 = vld [vmem:[%s3062_s2 + $0x690] sm:$0xff]  ;;  %v638_v47 = vld [vmem:[%s3062_s2 + $0x680] sm:$0xff] }
  0x49   :  { %837 = vmatpush.msrb.mxu2 %v588_v9  ;;  %857 = vmatpush.msrb.mxu3 %v620_v10  ;;  %v672_v46 = vld [vmem:[%s3062_s2 + $0x790] sm:$0xff]  ;;  %v670_v48 = vld [vmem:[%s3062_s2 + $0x780] sm:$0xff] }
  0x4a   :  { %803 = vmatpush.msrb.mxu0 %v512_v59  ;;  %823 = vmatpush.msrb.mxu1 %v544_v60  ;;  %v636_v49 = vld [vmem:[%s3062_s2 + $0x670] sm:$0xff]  ;;  %v634_v51 = vld [vmem:[%s3062_s2 + $0x660] sm:$0xff] }
  0x4b   :  { %838 = vmatpush.msrb.mxu2 %v586_v13  ;;  %858 = vmatpush.msrb.mxu3 %v618_v14  ;;  %v668_v50 = vld [vmem:[%s3062_s2 + $0x770] sm:$0xff]  ;;  %v666_v52 = vld [vmem:[%s3062_s2 + $0x760] sm:$0xff] }
  0x4c   :  { %804 = vmatpush.msrb.mxu0 %v510_v63  ;;  %824 = vmatpush.msrb.mxu1 %v542_v0  ;;  %v632_v53 = vld [vmem:[%s3062_s2 + $0x650] sm:$0xff]  ;;  %v630_v55 = vld [vmem:[%s3062_s2 + $0x640] sm:$0xff] }
  0x4d   :  { %839 = vmatpush.msrb.mxu2 %v584_v17  ;;  %859 = vmatpush.msrb.mxu3 %v616_v18  ;;  %v664_v54 = vld [vmem:[%s3062_s2 + $0x750] sm:$0xff]  ;;  %v662_v56 = vld [vmem:[%s3062_s2 + $0x740] sm:$0xff] }
  0x4e   :  { %805 = vmatpush.msrb.mxu0 %v508_v3  ;;  %825 = vmatpush.msrb.mxu1 %v540_v4  ;;  %v628_v57 = vld [vmem:[%s3062_s2 + $0x630] sm:$0xff]  ;;  %v626_v61 = vld [vmem:[%s3062_s2 + $0x620] sm:$0xff] }
  0x4f   :  { %840 = vmatpush.msrb.mxu2 %v582_v21  ;;  %860 = vmatpush.msrb.mxu3 %v614_v22  ;;  %v660_v58 = vld [vmem:[%s3062_s2 + $0x730] sm:$0xff]  ;;  %v658_v62 = vld [vmem:[%s3062_s2 + $0x720] sm:$0xff] }
  0x50   :  { %806 = vmatpush.msrb.mxu0 %v506_v7  ;;  %826 = vmatpush.msrb.mxu1 %v538_v8  ;;  %v576_v59 = vld [vmem:[%s3062_s2 + $0x490] sm:$0xff]  ;;  %v574_v63 = vld [vmem:[%s3062_s2 + $0x480] sm:$0xff] }
  0x51   :  { %841 = vmatpush.msrb.mxu2 %v580_v25  ;;  %861 = vmatpush.msrb.mxu3 %v612_v27  ;;  %v608_v60 = vld [vmem:[%s3062_s2 + $0x590] sm:$0xff]  ;;  %v606_v0 = vld [vmem:[%s3062_s2 + $0x580] sm:$0xff] }
  0x52   :  { %807 = vmatpush.msrb.mxu0 %v504_v11  ;;  %827 = vmatpush.msrb.mxu1 %v536_v12  ;;  %v624_v1 = vld [vmem:[%s3062_s2 + $0x610] sm:$0xff]  ;;  %v622_v5 = vld [vmem:[%s3062_s2 + $0x600] sm:$0xff] }
  0x53   :  { %842 = vmatpush.msrb.mxu2 %v578_v30  ;;  %862 = vmatpush.msrb.mxu3 %v610_v31  ;;  %v656_v2 = vld [vmem:[%s3062_s2 + $0x710] sm:$0xff]  ;;  %v654_v6 = vld [vmem:[%s3062_s2 + $0x700] sm:$0xff] }
  0x54   :  { %808 = vmatpush.msrb.mxu0 %v502_v15  ;;  %828 = vmatpush.msrb.mxu1 %v534_v16  ;;  %v572_v3 = vld [vmem:[%s3062_s2 + $0x470] sm:$0xff]  ;;  %v570_v7 = vld [vmem:[%s3062_s2 + $0x460] sm:$0xff] }
  0x55   :  { %843 = vmatpush.msrb.mxu2 %v576_v59  ;;  %863 = vmatpush.msrb.mxu3 %v608_v60  ;;  %v604_v4 = vld [vmem:[%s3062_s2 + $0x570] sm:$0xff]  ;;  %v602_v8 = vld [vmem:[%s3062_s2 + $0x560] sm:$0xff] }
  0x56   :  { %809 = vmatpush.msrb.mxu0 %v500_v19  ;;  %829 = vmatpush.msrb.mxu1 %v532_v20  ;;  %v568_v9 = vld [vmem:[%s3062_s2 + $0x450] sm:$0xff]  ;;  %v566_v11 = vld [vmem:[%s3062_s2 + $0x440] sm:$0xff] }
  0x57   :  { %844 = vmatpush.msrb.mxu2 %v574_v63  ;;  %864 = vmatpush.msrb.mxu3 %v606_v0  ;;  %v600_v10 = vld [vmem:[%s3062_s2 + $0x550] sm:$0xff]  ;;  %v598_v12 = vld [vmem:[%s3062_s2 + $0x540] sm:$0xff]  ;;  %v479_v63 = vld [vmem:[%s3062_s2 + $0x188] sm:$0xff] }
  0x58   :  { %810 = vmatpush.msrb.mxu0 %v498_v23  ;;  %830 = vmatpush.msrb.mxu1 %v530_v24  ;;  %v564_v13 = vld [vmem:[%s3062_s2 + $0x430] sm:$0xff]  ;;  %v562_v15 = vld [vmem:[%s3062_s2 + $0x420] sm:$0xff] }
  0x59   :  { %845 = vmatpush.msrb.mxu2 %v572_v3  ;;  %865 = vmatpush.msrb.mxu3 %v604_v4  ;;  %v596_v14 = vld [vmem:[%s3062_s2 + $0x530] sm:$0xff]  ;;  %v594_v16 = vld [vmem:[%s3062_s2 + $0x520] sm:$0xff] }
  0x5a   :  { %811 = vmatpush.msrb.mxu0 %v496_v28  ;;  %831 = vmatpush.msrb.mxu1 %v528_v29  ;;  %v560_v17 = vld [vmem:[%s3062_s2 + $0x410] sm:$0xff]  ;;  %v558_v21 = vld [vmem:[%s3062_s2 + $0x400] sm:$0xff] }
  0x5b   :  { %846 = vmatpush.msrb.mxu2 %v570_v7  ;;  %866 = vmatpush.msrb.mxu3 %v602_v8  ;;  %v592_v18 = vld [vmem:[%s3062_s2 + $0x510] sm:$0xff]  ;;  %v590_v22 = vld [vmem:[%s3062_s2 + $0x500] sm:$0xff] }
  0x5c   :  { %812 = vmatpush.msrb.mxu0 %v494_v32  ;;  %832 = vmatpush.msrb.mxu1 %v526_v33  ;;  %v105_v19 = vld [vmem:[%s3063_s4] ss:$8 sm:$0xf] }
  0x5d   :  { %847 = vmatpush.msrb.mxu2 %v568_v9  ;;  %867 = vmatpush.msrb.mxu3 %v600_v10  ;;  %v106_v20 = vld [vmem:[%s3063_s4] ss:$8 sm:$0xf0] }
  0x5e   :  { %877 = vmatpush.msra.mxu0 %v652_v34  ;;  %897 = vmatpush.msra.mxu1 %v684_v35  ;;  %v107_v23 = vor.u32 %v106_v20, %v105_v19  ;;  %v1390_v59 = vld [vmem:[%s3063_s4 + $0x40] ss:$8 sm:$0x30]  ;;  %v716_v3 = vld [vmem:[%s3062_s2 + $0x8f0] sm:$0xff] }
  0x5f   :  { %848 = vmatpush.msrb.mxu2 %v566_v11  ;;  %868 = vmatpush.msrb.mxu3 %v598_v12  ;;  %v748_v4 = vld [vmem:[%s3062_s2 + $0x9f0] sm:$0xff]  ;;  %v714_v7 = vld [vmem:[%s3062_s2 + $0x8e0] sm:$0xff]  ;;  %v443_v9 = vld [vmem:[%s3062_s2 + $0x68] sm:$0xff] }
  0x60   :  { %878 = vmatpush.msra.mxu0 %v650_v36  ;;  %898 = vmatpush.msra.mxu1 %v682_v37  ;;  %v114_v24 = vperm.slane %v107_v23, 0  ;;  %v115_v25 = vperm.slane %v107_v23, 1  ;;  %v120_v31 = vperm.slane %v107_v23, 6  ;;  %v121_v32 = vperm.slane %v107_v23, 7  ;;  %v461_v37 = vld [vmem:[%s3062_s2 + $0xf8] sm:$0xff]  ;;  %v746_v8 = vld [vmem:[%s3062_s2 + $0x9e0] sm:$0xff] }
  0x61   :  { %849 = vmatpush.msrb.mxu2 %v564_v13  ;;  %869 = vmatpush.msrb.mxu3 %v596_v14  ;;  %v475_v10 = vld [vmem:[%s3062_s2 + $0x168] sm:$0xff]  ;;  %v710_v19 = vld [vmem:[%s3062_s2 + $0x8c0] sm:$0xff] }
  0x62   :  { %879 = vmatpush.msra.mxu0 %v648_v38  ;;  %899 = vmatpush.msra.mxu1 %v680_v39  ;;  %v493_v38 = vld [vmem:[%s3062_s2 + $0x1f8] sm:$0xff]  ;;  %v116_v39 = vperm.slane %v107_v23, 2  ;;  %v742_v20 = vld [vmem:[%s3062_s2 + $0x9c0] sm:$0xff] }
  0x63   :  { %850 = vmatpush.msrb.mxu2 %v562_v15  ;;  %870 = vmatpush.msrb.mxu3 %v594_v16  ;;  %v712_v15 = vld [vmem:[%s3062_s2 + $0x8d0] sm:$0xff] }
  0x64   :  { %880 = vmatpush.msra.mxu0 %v646_v40  ;;  %900 = vmatpush.msra.mxu1 %v678_v41  ;;  %v117_v40 = vperm.slane %v107_v23, 3  ;;  %v459_v41 = vld [vmem:[%s3062_s2 + $0xe8] sm:$0xff]  ;;  %v744_v16 = vld [vmem:[%s3062_s2 + $0x9d0] sm:$0xff] }
  0x65   :  { %851 = vmatpush.msrb.mxu2 %v560_v17  ;;  %871 = vmatpush.msrb.mxu3 %v592_v18  ;;  %v441_v17 = vld [vmem:[%s3062_s2 + $0x58] sm:$0xff] }
  0x66   :  { %881 = vmatpush.msra.mxu0 %v644_v42  ;;  %901 = vmatpush.msra.mxu1 %v676_v43  ;;  %v491_v42 = vld [vmem:[%s3062_s2 + $0x1e8] sm:$0xff]  ;;  %v457_v43 = vld [vmem:[%s3062_s2 + $0xd8] sm:$0xff] }
  0x67   :  { %852 = vmatpush.msrb.mxu2 %v558_v21  ;;  %872 = vmatpush.msrb.mxu3 %v590_v22  ;;  %v473_v18 = vld [vmem:[%s3062_s2 + $0x158] sm:$0xff] }
  0x68   :  { %882 = vmatpush.msra.mxu0 %v642_v26  ;;  %902 = vmatpush.msra.mxu1 %v674_v44  ;;  %v489_v26 = vld [vmem:[%s3062_s2 + $0x1d8] sm:$0xff] }
  0x6a   :  { %883 = vmatpush.msra.mxu0 %v640_v45  ;;  %903 = vmatpush.msra.mxu1 %v672_v46 }
  0x6c   :  { %884 = vmatpush.msra.mxu0 %v638_v47  ;;  %904 = vmatpush.msra.mxu1 %v670_v48  ;;  %v455_v48 = vld [vmem:[%s3062_s2 + $0xc8] sm:$0xff] }
  0x6e   :  { %885 = vmatpush.msra.mxu0 %v636_v49  ;;  %905 = vmatpush.msra.mxu1 %v668_v50  ;;  %v487_v49 = vld [vmem:[%s3062_s2 + $0x1c8] sm:$0xff]  ;;  %v453_v50 = vld [vmem:[%s3062_s2 + $0xb8] sm:$0xff] }
  0x70   :  { %886 = vmatpush.msra.mxu0 %v634_v51  ;;  %906 = vmatpush.msra.mxu1 %v666_v52  ;;  %v485_v51 = vld [vmem:[%s3062_s2 + $0x1b8] sm:$0xff]  ;;  %v451_v52 = vld [vmem:[%s3062_s2 + $0xa8] sm:$0xff] }
  0x72   :  { %887 = vmatpush.msra.mxu0 %v632_v53  ;;  %907 = vmatpush.msra.mxu1 %v664_v54  ;;  %v483_v53 = vld [vmem:[%s3062_s2 + $0x1a8] sm:$0xff]  ;;  %v449_v54 = vld [vmem:[%s3062_s2 + $0x98] sm:$0xff] }
  0x74   :  { %888 = vmatpush.msra.mxu0 %v630_v55  ;;  %908 = vmatpush.msra.mxu1 %v662_v56  ;;  %v481_v55 = vld [vmem:[%s3062_s2 + $0x198] sm:$0xff]  ;;  %v118_v56 = vperm.slane %v107_v23, 4 }
  0x76   :  { %889 = vmatpush.msra.mxu0 %v628_v57  ;;  %909 = vmatpush.msra.mxu1 %v660_v58  ;;  %v119_v57 = vperm.slane %v107_v23, 5  ;;  %v1389_v58 = vld [vmem:[%s3063_s4 + $0x40] ss:$8 sm:$0xf] }
  0x77   :  { %v439_v23 = vld [vmem:[%s3062_s2 + $0x48] sm:$0xff] }
  0x78   :  { %890 = vmatpush.msra.mxu0 %v626_v61  ;;  %910 = vmatpush.msra.mxu1 %v658_v62  ;;  %v447_v62 = vld [vmem:[%s3062_s2 + $0x88] sm:$0xff] }
  0x7a   :  { %891 = vmatpush.msra.mxu0 %v624_v1  ;;  %911 = vmatpush.msra.mxu1 %v656_v2  ;;  %v2183_v2 = vor.u32 %v1390_v59, %v1389_v58  ;;  %v619_v58 = vld [vmem:[%s3062_s2 + $0x5e8] sm:$0xff]  ;;  %v698_v59 = vld [vmem:[%s3062_s2 + $0x860] sm:$0xff] }
  0x7c   :  { %892 = vmatpush.msra.mxu0 %v622_v5  ;;  %912 = vmatpush.msra.mxu1 %v654_v6  ;;  %v445_v5 = vld [vmem:[%s3062_s2 + $0x78] sm:$0xff]  ;;  %v124_v11 = vperm.slane %v2183_v2, 2  ;;  %v125_v12 = vperm.slane %v2183_v2, 3 }
  0x7d   :  { %v477_v6 = vld [vmem:[%s3062_s2 + $0x178] sm:$0xff] }
  0x8e   :  { %v163_v27 = vpop.f32.mrf.mxu0  ;;  %v183_v28 = vpop.f32.mrf.mxu1 }
  0x8f   :  { %v2111_v29 = vadd.f32 %v163_v27, %v114_v24  ;;  %v2113_v30 = vadd.f32 %v183_v28, %v115_v25  ;;  %v471_v24 = vld [vmem:[%s3062_s2 + $0x148] sm:$0xff]  ;;  %v122_v25 = vperm.slane %v2183_v2, 0  ;;  %v708_v27 = vld [vmem:[%s3062_s2 + $0x8b0] sm:$0xff] }
  0x90   :  { %v740_v28 = vld [vmem:[%s3062_s2 + $0x9b0] sm:$0xff] }
  0x92   :  { %v283_v33 = vpop.f32.mrf.mxu2  ;;  %v303_v34 = vpop.f32.mrf.mxu3 }
  0x93   :  { %v2115_v35 = vadd.f32 %v283_v33, %v120_v31  ;;  %v2117_v36 = vadd.f32 %v303_v34, %v121_v32  ;;  %v437_v32 = vld [vmem:[%s3062_s2 + $0x38] sm:$0xff]  ;;  %v123_v34 = vperm.slane %v2183_v2, 1 }
  0x94   :  { %v469_v33 = vld [vmem:[%s3062_s2 + $0x138] sm:$0xff] }
  0x95   :  { %813 = vmatmul.f32.vlgmr.msrb.gmra.mxu0 %v2115_v35  ;;  %833 = vmatmul.f32.vlgmr.msrb.gmra.mxu1 %v2117_v36 }
  0x96   :  { %957 = vmatpush.msrb.mxu0 %v461_v37  ;;  %977 = vmatpush.msrb.mxu1 %v493_v38  ;;  %v203_v44 = vpop.f32.mrf.mxu0  ;;  %v223_v45 = vpop.f32.mrf.mxu1  ;;  %v706_v38 = vld [vmem:[%s3062_s2 + $0x8a0] sm:$0xff] }
  0x97   :  { %v2139_v46 = vadd.f32 %v203_v44, %v116_v39  ;;  %v2141_v47 = vadd.f32 %v223_v45, %v117_v40  ;;  %v738_v39 = vld [vmem:[%s3062_s2 + $0x9a0] sm:$0xff]  ;;  %v704_v44 = vld [vmem:[%s3062_s2 + $0x890] sm:$0xff]  ;;  %v433_v45 = vld [vmem:[%s3062_s2 + $0x18] sm:$0xff] }
  0x98   :  { %958 = vmatpush.msrb.mxu0 %v459_v41  ;;  %978 = vmatpush.msrb.mxu1 %v491_v42  ;;  %v435_v41 = vld [vmem:[%s3062_s2 + $0x28] sm:$0xff] }
  0x99   :  { %v467_v42 = vld [vmem:[%s3062_s2 + $0x128] sm:$0xff] }
  0x9a   :  { %959 = vmatpush.msrb.mxu0 %v457_v43  ;;  %979 = vmatpush.msrb.mxu1 %v489_v26  ;;  %v736_v43 = vld [vmem:[%s3062_s2 + $0x990] sm:$0xff] }
  0x9c   :  { %960 = vmatpush.msrb.mxu0 %v455_v48  ;;  %980 = vmatpush.msrb.mxu1 %v487_v49  ;;  %v465_v48 = vld [vmem:[%s3062_s2 + $0x118] sm:$0xff]  ;;  %v702_v49 = vld [vmem:[%s3062_s2 + $0x880] sm:$0xff] }
  0x9e   :  { %961 = vmatpush.msrb.mxu0 %v453_v50  ;;  %981 = vmatpush.msrb.mxu1 %v485_v51  ;;  %v734_v50 = vld [vmem:[%s3062_s2 + $0x980] sm:$0xff]  ;;  %v431_v51 = vld [vmem:[%s3062_s2 + $0x8] sm:$0xff] }
  0xa0   :  { %962 = vmatpush.msrb.mxu0 %v451_v52  ;;  %982 = vmatpush.msrb.mxu1 %v483_v53  ;;  %v463_v52 = vld [vmem:[%s3062_s2 + $0x108] sm:$0xff]  ;;  %v589_v53 = vld [vmem:[%s3062_s2 + $0x4f8] sm:$0xff] }
  0xa2   :  { %v243_v60 = vpop.f32.mrf.mxu0  ;;  %v263_v61 = vpop.f32.mrf.mxu1  ;;  %963 = vmatpush.msrb.mxu0 %v449_v54  ;;  %983 = vmatpush.msrb.mxu1 %v481_v55  ;;  %v621_v54 = vld [vmem:[%s3062_s2 + $0x5f8] sm:$0xff]  ;;  %v700_v55 = vld [vmem:[%s3062_s2 + $0x870] sm:$0xff] }
  0xa3   :  { %v2179_v0 = vadd.f32 %v243_v60, %v118_v56  ;;  %v2181_v1 = vadd.f32 %v263_v61, %v119_v57  ;;  %v732_v56 = vld [vmem:[%s3062_s2 + $0x970] sm:$0xff]  ;;  %v587_v57 = vld [vmem:[%s3062_s2 + $0x4e8] sm:$0xff]  ;;  %v730_v60 = vld [vmem:[%s3062_s2 + $0x960] sm:$0xff] }
  0xa4   :  { %964 = vmatpush.msrb.mxu0 %v447_v62  ;;  %984 = vmatpush.msrb.mxu1 %v479_v63  ;;  %v363_v13 = vpop.f32.mrf.mxu2  ;;  %v383_v14 = vpop.f32.mrf.mxu3  ;;  %v585_v61 = vld [vmem:[%s3062_s2 + $0x4d8] sm:$0xff]  ;;  %v696_v63 = vld [vmem:[%s3062_s2 + $0x850] sm:$0xff] }
  0xa5   :  { %773 = vmatmul.f32.vlgmr.msra.gmra.mxu2 %v2179_v0  ;;  %793 = vmatmul.f32.vlgmr.msra.gmra.mxu3 %v2181_v1  ;;  %v2231_v21 = vadd.f32 %v363_v13, %v124_v11  ;;  %v2233_v22 = vadd.f32 %v383_v14, %v125_v12  ;;  %v617_v62 = vld [vmem:[%s3062_s2 + $0x5d8] sm:$0xff]  ;;  %v611_v11 = vld [vmem:[%s3062_s2 + $0x5a8] sm:$0xff]  ;;  %v690_v12 = vld [vmem:[%s3062_s2 + $0x820] sm:$0xff]  ;;  %v126_v14 = vperm.slane %v2183_v2, 4 }
  0xa6   :  { %917 = vmatpush.msra.mxu2 %v716_v3  ;;  %937 = vmatpush.msra.mxu3 %v748_v4  ;;  %v615_v3 = vld [vmem:[%s3062_s2 + $0x5c8] sm:$0xff]  ;;  %v694_v4 = vld [vmem:[%s3062_s2 + $0x840] sm:$0xff] }
  0xa7   :  { %965 = vmatpush.msrb.mxu0 %v445_v5  ;;  %985 = vmatpush.msrb.mxu1 %v477_v6  ;;  %v726_v5 = vld [vmem:[%s3062_s2 + $0x940] sm:$0xff]  ;;  %v581_v6 = vld [vmem:[%s3062_s2 + $0x4b8] sm:$0xff] }
  0xa8   :  { %918 = vmatpush.msra.mxu2 %v714_v7  ;;  %938 = vmatpush.msra.mxu3 %v746_v8  ;;  %v613_v7 = vld [vmem:[%s3062_s2 + $0x5b8] sm:$0xff]  ;;  %v692_v8 = vld [vmem:[%s3062_s2 + $0x830] sm:$0xff]  ;;  %v722_v13 = vld [vmem:[%s3062_s2 + $0x920] sm:$0xff] }
  0xa9   :  { %966 = vmatpush.msrb.mxu0 %v443_v9  ;;  %986 = vmatpush.msrb.mxu1 %v475_v10  ;;  %v724_v9 = vld [vmem:[%s3062_s2 + $0x930] sm:$0xff]  ;;  %v579_v10 = vld [vmem:[%s3062_s2 + $0x4a8] sm:$0xff] }
  0xaa   :  { %919 = vmatpush.msra.mxu2 %v712_v15  ;;  %939 = vmatpush.msra.mxu3 %v744_v16  ;;  %v577_v15 = vld [vmem:[%s3062_s2 + $0x498] sm:$0xff] }
  0xab   :  { %967 = vmatpush.msrb.mxu0 %v441_v17  ;;  %987 = vmatpush.msrb.mxu1 %v473_v18  ;;  %v609_v16 = vld [vmem:[%s3062_s2 + $0x598] sm:$0xff]  ;;  %v688_v18 = vld [vmem:[%s3062_s2 + $0x810] sm:$0xff] }
  0xac   :  { %920 = vmatpush.msra.mxu2 %v710_v19  ;;  %940 = vmatpush.msra.mxu3 %v742_v20  ;;  %v720_v19 = vld [vmem:[%s3062_s2 + $0x910] sm:$0xff]  ;;  %v127_v20 = vperm.slane %v2183_v2, 5  ;;  %v718_v2 = vld [vmem:[%s3062_s2 + $0x900] sm:$0xff] }
  0xad   :  { %968 = vmatpush.msrb.mxu0 %v439_v23  ;;  %988 = vmatpush.msrb.mxu1 %v471_v24  ;;  %v575_v23 = vld [vmem:[%s3062_s2 + $0x488] sm:$0xff] }
  0xae   :  { %v323_v31 = vpop.f32.mrf.mxu0  ;;  %893 = vmatmul.f32.vlgmr.msra.gmra.mxu0 %v2231_v21  ;;  %913 = vmatmul.f32.vlgmr.msra.gmra.mxu1 %v2233_v22  ;;  %v343_v37 = vpop.f32.mrf.mxu1  ;;  %v607_v24 = vld [vmem:[%s3062_s2 + $0x588] sm:$0xff] }
  0xaf   :  { %v2263_v40 = vadd.f32 %v323_v31, %v122_v25  ;;  %921 = vmatpush.msra.mxu2 %v708_v27  ;;  %941 = vmatpush.msra.mxu3 %v740_v28  ;;  %v2274_v26 = vadd.f32 %v343_v37, %v123_v34  ;;  %v686_v28 = vld [vmem:[%s3062_s2 + $0x800] sm:$0xff]  ;;  %v557_v31 = vld [vmem:[%s3062_s2 + $0x3f8] sm:$0xff] }
  0xb0   :  { %969 = vmatpush.msrb.mxu0 %v437_v32  ;;  %989 = vmatpush.msrb.mxu1 %v469_v33  ;;  %v525_v33 = vld [vmem:[%s3062_s2 + $0x2f8] sm:$0xff] }
  0xb1   :  { %922 = vmatpush.msra.mxu2 %v706_v38  ;;  %942 = vmatpush.msra.mxu3 %v738_v39  ;;  %v573_v34 = vld [vmem:[%s3062_s2 + $0x478] sm:$0xff]  ;;  %v523_v38 = vld [vmem:[%s3062_s2 + $0x2e8] sm:$0xff] }
  0xb2   :  { %970 = vmatpush.msrb.mxu0 %v435_v41  ;;  %990 = vmatpush.msrb.mxu1 %v467_v42  ;;  %v605_v37 = vld [vmem:[%s3062_s2 + $0x578] sm:$0xff]  ;;  %v555_v39 = vld [vmem:[%s3062_s2 + $0x3e8] sm:$0xff] }
  0xb3   :  { %853 = vmatmul.f32.vlgmr.msrb.gmra.mxu2 %v2263_v40  ;;  %943 = vmatpush.msra.mxu3 %v736_v43  ;;  %v571_v41 = vld [vmem:[%s3062_s2 + $0x468] sm:$0xff]  ;;  %v521_v43 = vld [vmem:[%s3062_s2 + $0x2d8] sm:$0xff] }
  0xb4   :  { %923 = vmatpush.msra.mxu2 %v704_v44  ;;  %971 = vmatpush.msrb.mxu0 %v433_v45  ;;  %v603_v42 = vld [vmem:[%s3062_s2 + $0x568] sm:$0xff]  ;;  %v553_v44 = vld [vmem:[%s3062_s2 + $0x3d8] sm:$0xff] }
  0xb5   :  { %991 = vmatpush.msrb.mxu1 %v465_v48  ;;  %873 = vmatmul.f32.vlgmr.msrb.gmra.mxu3 %v2274_v26  ;;  %v569_v45 = vld [vmem:[%s3062_s2 + $0x458] sm:$0xff] }
  0xb6   :  { %924 = vmatpush.msra.mxu2 %v702_v49  ;;  %944 = vmatpush.msra.mxu3 %v734_v50  ;;  %v601_v48 = vld [vmem:[%s3062_s2 + $0x558] sm:$0xff]  ;;  %v519_v49 = vld [vmem:[%s3062_s2 + $0x2c8] sm:$0xff] }
  0xb7   :  { %972 = vmatpush.msrb.mxu0 %v431_v51  ;;  %992 = vmatpush.msrb.mxu1 %v463_v52  ;;  %v551_v50 = vld [vmem:[%s3062_s2 + $0x3c8] sm:$0xff] }
  0xb8   :  { %973 = vmatmul.f32.vlgmr.msrb.gmra.mxu0 %v2179_v0  ;;  %993 = vmatmul.f32.vlgmr.msrb.gmra.mxu1 %v2181_v1  ;;  %v728_v0 = vld [vmem:[%s3062_s2 + $0x950] sm:$0xff]  ;;  %v583_v1 = vld [vmem:[%s3062_s2 + $0x4c8] sm:$0xff] }
  0xb9   :  { %1037 = vmatpush.msra.mxu0 %v589_v53  ;;  %1057 = vmatpush.msra.mxu1 %v621_v54  ;;  %v567_v51 = vld [vmem:[%s3062_s2 + $0x448] sm:$0xff]  ;;  %v517_v53 = vld [vmem:[%s3062_s2 + $0x2b8] sm:$0xff] }
  0xba   :  { %925 = vmatpush.msra.mxu2 %v700_v55  ;;  %945 = vmatpush.msra.mxu3 %v732_v56  ;;  %v403_v17 = vpop.f32.mrf.mxu0  ;;  %v423_v25 = vpop.f32.mrf.mxu1  ;;  %v599_v52 = vld [vmem:[%s3062_s2 + $0x548] sm:$0xff]  ;;  %v549_v54 = vld [vmem:[%s3062_s2 + $0x3b8] sm:$0xff] }
  0xbb   :  { %1038 = vmatpush.msra.mxu0 %v587_v57  ;;  %1058 = vmatpush.msra.mxu1 %v619_v58  ;;  %v2393_v27 = vadd.f32 %v403_v17, %v126_v14  ;;  %v2404_v32 = vadd.f32 %v423_v25, %v127_v20  ;;  %v565_v55 = vld [vmem:[%s3062_s2 + $0x438] sm:$0xff]  ;;  %v515_v57 = vld [vmem:[%s3062_s2 + $0x2a8] sm:$0xff] }
  0xbc   :  { %926 = vmatpush.msra.mxu2 %v698_v59  ;;  %946 = vmatpush.msra.mxu3 %v730_v60  ;;  %v597_v56 = vld [vmem:[%s3062_s2 + $0x538] sm:$0xff]  ;;  %v547_v58 = vld [vmem:[%s3062_s2 + $0x3a8] sm:$0xff] }
  0xbd   :  { %1039 = vmatpush.msra.mxu0 %v585_v61  ;;  %1059 = vmatpush.msra.mxu1 %v617_v62  ;;  %v563_v59 = vld [vmem:[%s3062_s2 + $0x428] sm:$0xff]  ;;  %v513_v61 = vld [vmem:[%s3062_s2 + $0x298] sm:$0xff] }
  0xbe   :  { %927 = vmatpush.msra.mxu2 %v696_v63  ;;  %947 = vmatpush.msra.mxu3 %v728_v0  ;;  %v595_v60 = vld [vmem:[%s3062_s2 + $0x528] sm:$0xff]  ;;  %v545_v62 = vld [vmem:[%s3062_s2 + $0x398] sm:$0xff] }
  0xbf   :  { %1040 = vmatpush.msra.mxu0 %v583_v1  ;;  %1060 = vmatpush.msra.mxu1 %v615_v3  ;;  %v561_v63 = vld [vmem:[%s3062_s2 + $0x418] sm:$0xff]  ;;  %v511_v1 = vld [vmem:[%s3062_s2 + $0x288] sm:$0xff] }
  0xc0   :  { %928 = vmatpush.msra.mxu2 %v694_v4  ;;  %948 = vmatpush.msra.mxu3 %v726_v5  ;;  %v593_v0 = vld [vmem:[%s3062_s2 + $0x518] sm:$0xff]  ;;  %v543_v3 = vld [vmem:[%s3062_s2 + $0x388] sm:$0xff] }
  0xc1   :  { %1041 = vmatpush.msra.mxu0 %v581_v6  ;;  %1061 = vmatpush.msra.mxu1 %v613_v7  ;;  %v559_v4 = vld [vmem:[%s3062_s2 + $0x408] sm:$0xff]  ;;  %v717_v6 = vld [vmem:[%s3062_s2 + $0x8f8] sm:$0xff] }
  0xc2   :  { %929 = vmatpush.msra.mxu2 %v692_v8  ;;  %949 = vmatpush.msra.mxu3 %v724_v9  ;;  %v591_v5 = vld [vmem:[%s3062_s2 + $0x508] sm:$0xff]  ;;  %v749_v7 = vld [vmem:[%s3062_s2 + $0x9f8] sm:$0xff] }
  0xc3   :  { %1042 = vmatpush.msra.mxu0 %v579_v10  ;;  %1062 = vmatpush.msra.mxu1 %v611_v11  ;;  %v509_v8 = vld [vmem:[%s3062_s2 + $0x278] sm:$0xff]  ;;  %v715_v10 = vld [vmem:[%s3062_s2 + $0x8e8] sm:$0xff] }
  0xc4   :  { %930 = vmatpush.msra.mxu2 %v690_v12  ;;  %950 = vmatpush.msra.mxu3 %v722_v13  ;;  %v541_v9 = vld [vmem:[%s3062_s2 + $0x378] sm:$0xff]  ;;  %v747_v11 = vld [vmem:[%s3062_s2 + $0x9e8] sm:$0xff] }
  0xc5   :  { %1043 = vmatpush.msra.mxu0 %v577_v15  ;;  %1063 = vmatpush.msra.mxu1 %v609_v16  ;;  %v507_v12 = vld [vmem:[%s3062_s2 + $0x268] sm:$0xff]  ;;  %v745_v13 = vld [vmem:[%s3062_s2 + $0x9d8] sm:$0xff] }
  0xc6   :  { %931 = vmatpush.msra.mxu2 %v688_v18  ;;  %951 = vmatpush.msra.mxu3 %v720_v19  ;;  %v505_v14 = vld [vmem:[%s3062_s2 + $0x258] sm:$0xff]  ;;  %v711_v16 = vld [vmem:[%s3062_s2 + $0x8c8] sm:$0xff] }
  0xc7   :  { %1044 = vmatpush.msra.mxu0 %v575_v23  ;;  %1064 = vmatpush.msra.mxu1 %v607_v24  ;;  %v537_v15 = vld [vmem:[%s3062_s2 + $0x358] sm:$0xff]  ;;  %v743_v17 = vld [vmem:[%s3062_s2 + $0x9c8] sm:$0xff] }
  0xc8   :  { %932 = vmatpush.msra.mxu2 %v686_v28  ;;  %952 = vmatpush.msra.mxu3 %v718_v2  ;;  %v503_v18 = vld [vmem:[%s3062_s2 + $0x248] sm:$0xff]  ;;  %v709_v20 = vld [vmem:[%s3062_s2 + $0x8b8] sm:$0xff] }
  0xc9   :  { %933 = vmatmul.f32.vlgmr.msra.gmra.mxu2 %v2393_v27  ;;  %1045 = vmatpush.msra.mxu0 %v573_v34  ;;  %v535_v19 = vld [vmem:[%s3062_s2 + $0x348] sm:$0xff]  ;;  %v741_v23 = vld [vmem:[%s3062_s2 + $0x9b8] sm:$0xff] }
  0xca   :  { %1017 = vmatpush.msrb.mxu3 %v557_v31  ;;  %997 = vmatpush.msrb.mxu2 %v525_v33  ;;  %v501_v24 = vld [vmem:[%s3062_s2 + $0x238] sm:$0xff]  ;;  %v707_v28 = vld [vmem:[%s3062_s2 + $0x8a8] sm:$0xff] }
  0xcb   :  { %1065 = vmatpush.msra.mxu1 %v605_v37  ;;  %953 = vmatmul.f32.vlgmr.msra.gmra.mxu3 %v2404_v32  ;;  %v533_v25 = vld [vmem:[%s3062_s2 + $0x338] sm:$0xff]  ;;  %v739_v2 = vld [vmem:[%s3062_s2 + $0x9a8] sm:$0xff] }
  0xcc   :  { %998 = vmatpush.msrb.mxu2 %v523_v38  ;;  %1018 = vmatpush.msrb.mxu3 %v555_v39  ;;  %v499_v31 = vld [vmem:[%s3062_s2 + $0x228] sm:$0xff]  ;;  %v705_v34 = vld [vmem:[%s3062_s2 + $0x898] sm:$0xff] }
  0xcd   :  { %1046 = vmatpush.msra.mxu0 %v571_v41  ;;  %1066 = vmatpush.msra.mxu1 %v603_v42  ;;  %v531_v33 = vld [vmem:[%s3062_s2 + $0x328] sm:$0xff]  ;;  %v737_v37 = vld [vmem:[%s3062_s2 + $0x998] sm:$0xff] }
  0xce   :  { %999 = vmatpush.msrb.mxu2 %v521_v43  ;;  %1019 = vmatpush.msrb.mxu3 %v553_v44  ;;  %v497_v38 = vld [vmem:[%s3062_s2 + $0x218] sm:$0xff]  ;;  %v703_v41 = vld [vmem:[%s3062_s2 + $0x888] sm:$0xff] }
  0xcf   :  { %1047 = vmatpush.msra.mxu0 %v569_v45  ;;  %1067 = vmatpush.msra.mxu1 %v601_v48  ;;  %v529_v39 = vld [vmem:[%s3062_s2 + $0x318] sm:$0xff]  ;;  %v735_v42 = vld [vmem:[%s3062_s2 + $0x988] sm:$0xff] }
  0xd0   :  { %1000 = vmatpush.msrb.mxu2 %v519_v49  ;;  %1020 = vmatpush.msrb.mxu3 %v551_v50  ;;  %v495_v43 = vld [vmem:[%s3062_s2 + $0x208] sm:$0xff]  ;;  %v653_v45 = vld [vmem:[%s3062_s2 + $0x6f8] sm:$0xff] }
  0xd1   :  { %1048 = vmatpush.msra.mxu0 %v567_v51  ;;  %1068 = vmatpush.msra.mxu1 %v599_v52  ;;  %v527_v44 = vld [vmem:[%s3062_s2 + $0x308] sm:$0xff]  ;;  %v685_v48 = vld [vmem:[%s3062_s2 + $0x7f8] sm:$0xff] }
  0xd2   :  { %1001 = vmatpush.msrb.mxu2 %v517_v53  ;;  %1021 = vmatpush.msrb.mxu3 %v549_v54  ;;  %v701_v49 = vld [vmem:[%s3062_s2 + $0x878] sm:$0xff]  ;;  %v651_v51 = vld [vmem:[%s3062_s2 + $0x6e8] sm:$0xff] }
  0xd3   :  { %1049 = vmatpush.msra.mxu0 %v565_v55  ;;  %1069 = vmatpush.msra.mxu1 %v597_v56  ;;  %v733_v50 = vld [vmem:[%s3062_s2 + $0x978] sm:$0xff]  ;;  %v683_v52 = vld [vmem:[%s3062_s2 + $0x7e8] sm:$0xff] }
  0xd4   :  { %1002 = vmatpush.msrb.mxu2 %v515_v57  ;;  %1022 = vmatpush.msrb.mxu3 %v547_v58  ;;  %v699_v53 = vld [vmem:[%s3062_s2 + $0x868] sm:$0xff]  ;;  %v681_v54 = vld [vmem:[%s3062_s2 + $0x7d8] sm:$0xff] }
  0xd5   :  { %1050 = vmatpush.msra.mxu0 %v563_v59  ;;  %1070 = vmatpush.msra.mxu1 %v595_v60  ;;  %v697_v55 = vld [vmem:[%s3062_s2 + $0x858] sm:$0xff]  ;;  %v647_v57 = vld [vmem:[%s3062_s2 + $0x6c8] sm:$0xff] }
  0xd6   :  { %1003 = vmatpush.msrb.mxu2 %v513_v61  ;;  %1023 = vmatpush.msrb.mxu3 %v545_v62  ;;  %v729_v56 = vld [vmem:[%s3062_s2 + $0x958] sm:$0xff]  ;;  %v679_v58 = vld [vmem:[%s3062_s2 + $0x7c8] sm:$0xff] }
  0xd7   :  { %1051 = vmatpush.msra.mxu0 %v561_v63  ;;  %1071 = vmatpush.msra.mxu1 %v593_v0  ;;  %v695_v59 = vld [vmem:[%s3062_s2 + $0x848] sm:$0xff]  ;;  %v645_v61 = vld [vmem:[%s3062_s2 + $0x6b8] sm:$0xff] }
  0xd8   :  { %1004 = vmatpush.msrb.mxu2 %v511_v1  ;;  %1024 = vmatpush.msrb.mxu3 %v543_v3  ;;  %v727_v60 = vld [vmem:[%s3062_s2 + $0x948] sm:$0xff]  ;;  %v677_v62 = vld [vmem:[%s3062_s2 + $0x7b8] sm:$0xff] }
  0xd9   :  { %1052 = vmatpush.msra.mxu0 %v559_v4  ;;  %1072 = vmatpush.msra.mxu1 %v591_v5  ;;  %v693_v63 = vld [vmem:[%s3062_s2 + $0x838] sm:$0xff]  ;;  %v643_v1 = vld [vmem:[%s3062_s2 + $0x6a8] sm:$0xff] }
  0xda   :  { %1053 = vmatmul.f32.vlgmr.msra.gmra.mxu0 %v2263_v40  ;;  %1073 = vmatmul.f32.vlgmr.msra.gmra.mxu1 %v2274_v26  ;;  %v539_v40 = vld [vmem:[%s3062_s2 + $0x368] sm:$0xff]  ;;  %v713_v26 = vld [vmem:[%s3062_s2 + $0x8d8] sm:$0xff] }
  0xdb   :  { %1117 = vmatpush.msrb.mxu0 %v717_v6  ;;  %1137 = vmatpush.msrb.mxu1 %v749_v7  ;;  %v725_v0 = vld [vmem:[%s3062_s2 + $0x938] sm:$0xff]  ;;  %v675_v3 = vld [vmem:[%s3062_s2 + $0x7a8] sm:$0xff] }
  0xdc   :  { %1005 = vmatpush.msrb.mxu2 %v509_v8  ;;  %1025 = vmatpush.msrb.mxu3 %v541_v9  ;;  %v691_v4 = vld [vmem:[%s3062_s2 + $0x828] sm:$0xff]  ;;  %v641_v6 = vld [vmem:[%s3062_s2 + $0x698] sm:$0xff] }
  0xdd   :  { %1118 = vmatpush.msrb.mxu0 %v715_v10  ;;  %1138 = vmatpush.msrb.mxu1 %v747_v11  ;;  %v723_v5 = vld [vmem:[%s3062_s2 + $0x928] sm:$0xff]  ;;  %v673_v7 = vld [vmem:[%s3062_s2 + $0x798] sm:$0xff] }
  0xde   :  { %1006 = vmatpush.msrb.mxu2 %v507_v12  ;;  %1026 = vmatpush.msrb.mxu3 %v539_v40  ;;  %v689_v8 = vld [vmem:[%s3062_s2 + $0x818] sm:$0xff]  ;;  %v639_v10 = vld [vmem:[%s3062_s2 + $0x688] sm:$0xff] }
  0xdf   :  { %1119 = vmatpush.msrb.mxu0 %v713_v26  ;;  %1139 = vmatpush.msrb.mxu1 %v745_v13  ;;  %v721_v9 = vld [vmem:[%s3062_s2 + $0x918] sm:$0xff]  ;;  %v671_v11 = vld [vmem:[%s3062_s2 + $0x788] sm:$0xff] }
  0xe0   :  { %1007 = vmatpush.msrb.mxu2 %v505_v14  ;;  %1027 = vmatpush.msrb.mxu3 %v537_v15  ;;  %v687_v12 = vld [vmem:[%s3062_s2 + $0x808] sm:$0xff]  ;;  %v1206_v26 = vld [vmem:[%s3064_s3 + $0x178] sm:$0xff] }
  0xe1   :  { %1120 = vmatpush.msrb.mxu0 %v711_v16  ;;  %1140 = vmatpush.msrb.mxu1 %v743_v17  ;;  %v719_v40 = vld [vmem:[%s3062_s2 + $0x908] sm:$0xff]  ;;  %v1222_v13 = vld [vmem:[%s3064_s3 + $0x1f8] sm:$0xff]  ;;  %v1205_v16 = vld [vmem:[%s3064_s3 + $0x170] sm:$0xff] }
  0xe2   :  { %1008 = vmatpush.msrb.mxu2 %v503_v18  ;;  %1028 = vmatpush.msrb.mxu3 %v535_v19  ;;  %v637_v14 = vld [vmem:[%s3062_s2 + $0x678] sm:$0xff]  ;;  %v1221_v17 = vld [vmem:[%s3064_s3 + $0x1f0] sm:$0xff]  ;;  %v635_v18 = vld [vmem:[%s3062_s2 + $0x668] sm:$0xff] }
  0xe3   :  { %1121 = vmatpush.msrb.mxu0 %v709_v20  ;;  %1141 = vmatpush.msrb.mxu1 %v741_v23  ;;  %v669_v15 = vld [vmem:[%s3062_s2 + $0x778] sm:$0xff]  ;;  %v1220_v19 = vld [vmem:[%s3064_s3 + $0x1e8] sm:$0xff] }
  0xe4   :  { %1009 = vmatpush.msrb.mxu2 %v501_v24  ;;  %1029 = vmatpush.msrb.mxu3 %v533_v25  ;;  %v633_v20 = vld [vmem:[%s3062_s2 + $0x658] sm:$0xff]  ;;  %v1203_v24 = vld [vmem:[%s3064_s3 + $0x160] sm:$0xff] }
  0xe5   :  { %1122 = vmatpush.msrb.mxu0 %v707_v28  ;;  %1142 = vmatpush.msrb.mxu1 %v739_v2  ;;  %v665_v23 = vld [vmem:[%s3062_s2 + $0x758] sm:$0xff]  ;;  %v1219_v25 = vld [vmem:[%s3064_s3 + $0x1e0] sm:$0xff]  ;;  %v631_v28 = vld [vmem:[%s3062_s2 + $0x648] sm:$0xff] }
  0xe6   :  { %1010 = vmatpush.msrb.mxu2 %v499_v31  ;;  %1030 = vmatpush.msrb.mxu3 %v531_v33  ;;  %v663_v2 = vld [vmem:[%s3062_s2 + $0x748] sm:$0xff]  ;;  %v1202_v31 = vld [vmem:[%s3064_s3 + $0x158] sm:$0xff] }
  0xe7   :  { %1123 = vmatpush.msrb.mxu0 %v705_v34  ;;  %1143 = vmatpush.msrb.mxu1 %v737_v37  ;;  %v1218_v33 = vld [vmem:[%s3064_s3 + $0x1d8] sm:$0xff] }
  0xe8   :  { %1011 = vmatpush.msrb.mxu2 %v497_v38  ;;  %1031 = vmatpush.msrb.mxu3 %v529_v39  ;;  %v629_v34 = vld [vmem:[%s3062_s2 + $0x638] sm:$0xff]  ;;  %v1201_v38 = vld [vmem:[%s3064_s3 + $0x150] sm:$0xff] }
  0xe9   :  { %1124 = vmatpush.msrb.mxu0 %v703_v41  ;;  %1144 = vmatpush.msrb.mxu1 %v735_v42  ;;  %v661_v37 = vld [vmem:[%s3062_s2 + $0x738] sm:$0xff]  ;;  %v1217_v39 = vld [vmem:[%s3064_s3 + $0x1d0] sm:$0xff]  ;;  %v627_v41 = vld [vmem:[%s3062_s2 + $0x628] sm:$0xff] }
  0xea   :  { %1012 = vmatpush.msrb.mxu2 %v495_v43  ;;  %1032 = vmatpush.msrb.mxu3 %v527_v44  ;;  %v659_v42 = vld [vmem:[%s3062_s2 + $0x728] sm:$0xff] }
  0xeb   :  { %1013 = vmatmul.f32.vlgmr.msrb.gmra.mxu2 %v2115_v35  ;;  %1033 = vmatmul.f32.vlgmr.msrb.gmra.mxu3 %v2117_v36  ;;  %v731_v35 = vld [vmem:[%s3062_s2 + $0x968] sm:$0xff]  ;;  %v649_v36 = vld [vmem:[%s3062_s2 + $0x6d8] sm:$0xff] }
  0xec   :  { %1077 = vmatpush.msra.mxu2 %v653_v45  ;;  %1097 = vmatpush.msra.mxu3 %v685_v48  ;;  %v1200_v43 = vld [vmem:[%s3064_s3 + $0x148] sm:$0xff]  ;;  %v625_v45 = vld [vmem:[%s3062_s2 + $0x618] sm:$0xff] }
  0xed   :  { %1125 = vmatpush.msrb.mxu0 %v701_v49  ;;  %1145 = vmatpush.msrb.mxu1 %v733_v50  ;;  %v1216_v44 = vld [vmem:[%s3064_s3 + $0x1c8] sm:$0xff]  ;;  %v657_v48 = vld [vmem:[%s3062_s2 + $0x718] sm:$0xff]  ;;  %v1199_v49 = vld [vmem:[%s3064_s3 + $0x140] sm:$0xff] }
  0xee   :  { %1078 = vmatpush.msra.mxu2 %v651_v51  ;;  %1098 = vmatpush.msra.mxu3 %v683_v52  ;;  %v1215_v50 = vld [vmem:[%s3064_s3 + $0x1c0] sm:$0xff]  ;;  %v623_v51 = vld [vmem:[%s3062_s2 + $0x608] sm:$0xff] }
  0xef   :  { %1126 = vmatpush.msrb.mxu0 %v699_v53  ;;  %1146 = vmatpush.msrb.mxu1 %v731_v35  ;;  %v655_v52 = vld [vmem:[%s3062_s2 + $0x708] sm:$0xff]  ;;  %v1174_v53 = vld [vmem:[%s3064_s3 + $0x78] sm:$0xff] }
  0xf0   :  { %1079 = vmatpush.msra.mxu2 %v649_v36  ;;  %1099 = vmatpush.msra.mxu3 %v681_v54  ;;  %v1190_v35 = vld [vmem:[%s3064_s3 + $0xf8] sm:$0xff] }
  0xf1   :  { %1127 = vmatpush.msrb.mxu0 %v697_v55  ;;  %1147 = vmatpush.msrb.mxu1 %v729_v56  ;;  %v1198_v36 = vld [vmem:[%s3064_s3 + $0x138] sm:$0xff]  ;;  %v1173_v55 = vld [vmem:[%s3064_s3 + $0x70] sm:$0xff] }
  0xf2   :  { %1080 = vmatpush.msra.mxu2 %v647_v57  ;;  %1100 = vmatpush.msra.mxu3 %v679_v58  ;;  %v1214_v54 = vld [vmem:[%s3064_s3 + $0x1b8] sm:$0xff]  ;;  %v1189_v56 = vld [vmem:[%s3064_s3 + $0xf0] sm:$0xff]  ;;  %v1188_v58 = vld [vmem:[%s3064_s3 + $0xe8] sm:$0xff] }
  0xf3   :  { %1128 = vmatpush.msrb.mxu0 %v695_v59  ;;  %1148 = vmatpush.msrb.mxu1 %v727_v60  ;;  %v1197_v57 = vld [vmem:[%s3064_s3 + $0x130] sm:$0xff]  ;;  %v1196_v59 = vld [vmem:[%s3064_s3 + $0x128] sm:$0xff] }
  0xf4   :  { %1081 = vmatpush.msra.mxu2 %v645_v61  ;;  %1101 = vmatpush.msra.mxu3 %v677_v62  ;;  %v1212_v60 = vld [vmem:[%s3064_s3 + $0x1a8] sm:$0xff]  ;;  %v1171_v61 = vld [vmem:[%s3064_s3 + $0x60] sm:$0xff] }
  0xf5   :  { %1129 = vmatpush.msrb.mxu0 %v693_v63  ;;  %1149 = vmatpush.msrb.mxu1 %v725_v0  ;;  %v1187_v62 = vld [vmem:[%s3064_s3 + $0xe0] sm:$0xff] }
  0xf6   :  { %1082 = vmatpush.msra.mxu2 %v643_v1  ;;  %1102 = vmatpush.msra.mxu3 %v675_v3  ;;  %v1195_v63 = vld [vmem:[%s3064_s3 + $0x120] sm:$0xff]  ;;  %v1170_v1 = vld [vmem:[%s3064_s3 + $0x58] sm:$0xff] }
  0xf7   :  { %1130 = vmatpush.msrb.mxu0 %v691_v4  ;;  %1150 = vmatpush.msrb.mxu1 %v723_v5  ;;  %v1211_v0 = vld [vmem:[%s3064_s3 + $0x1a0] sm:$0xff]  ;;  %v1186_v3 = vld [vmem:[%s3064_s3 + $0xd8] sm:$0xff] }
  0xf8   :  { %1083 = vmatpush.msra.mxu2 %v641_v6  ;;  %1103 = vmatpush.msra.mxu3 %v673_v7  ;;  %v1194_v4 = vld [vmem:[%s3064_s3 + $0x118] sm:$0xff]  ;;  %v1169_v6 = vld [vmem:[%s3064_s3 + $0x50] sm:$0xff] }
  0xf9   :  { %1131 = vmatpush.msrb.mxu0 %v689_v8  ;;  %1151 = vmatpush.msrb.mxu1 %v721_v9  ;;  %v1210_v5 = vld [vmem:[%s3064_s3 + $0x198] sm:$0xff]  ;;  %v1185_v7 = vld [vmem:[%s3064_s3 + $0xd0] sm:$0xff] }
  0xfa   :  { %1084 = vmatpush.msra.mxu2 %v639_v10  ;;  %1104 = vmatpush.msra.mxu3 %v671_v11  ;;  %v1193_v8 = vld [vmem:[%s3064_s3 + $0x110] sm:$0xff]  ;;  %v1168_v10 = vld [vmem:[%s3064_s3 + $0x48] sm:$0xff] }
  0xfb   :  { %1132 = vmatpush.msrb.mxu0 %v687_v12  ;;  %1152 = vmatpush.msrb.mxu1 %v719_v40  ;;  %v1209_v9 = vld [vmem:[%s3064_s3 + $0x190] sm:$0xff]  ;;  %v1184_v11 = vld [vmem:[%s3064_s3 + $0xc8] sm:$0xff] }
  0xfc   :  { %1133 = vmatmul.f32.vlgmr.msrb.gmra.mxu0 %v2393_v27  ;;  %1153 = vmatmul.f32.vlgmr.msrb.gmra.mxu1 %v2404_v32  ;;  %v667_v27 = vld [vmem:[%s3062_s2 + $0x768] sm:$0xff] }
  0xfd   :  { %1296 = vmatpush.msra.mxu0 %v1206_v26  ;;  %1316 = vmatpush.msra.mxu1 %v1222_v13  ;;  %v1204_v32 = vld [vmem:[%s3064_s3 + $0x168] sm:$0xff]  ;;  %v1167_v26 = vld [vmem:[%s3064_s3 + $0x40] sm:$0xff] }
  0xfe   :  { %1085 = vmatpush.msra.mxu2 %v637_v14  ;;  %1105 = vmatpush.msra.mxu3 %v669_v15  ;;  %v1192_v12 = vld [vmem:[%s3064_s3 + $0x108] sm:$0xff]  ;;  %v1183_v13 = vld [vmem:[%s3064_s3 + $0xc0] sm:$0xff] }
  0xff   :  { %1297 = vmatpush.msra.mxu0 %v1205_v16  ;;  %1317 = vmatpush.msra.mxu1 %v1221_v17  ;;  %v1208_v40 = vld [vmem:[%s3064_s3 + $0x188] sm:$0xff]  ;;  %v1191_v14 = vld [vmem:[%s3064_s3 + $0x100] sm:$0xff]  ;;  %v428_v16 = vmax.f32 %v2139_v46, 0.0  ;;  %v429_v17 = vmax.f32 %v2141_v47, 0.0  ;;  %v1165_v46 = vld [vmem:[%s3064_s3 + $0x30] sm:$0xff] }
 0x100   :  { %1086 = vmatpush.msra.mxu2 %v635_v18  ;;  %1106 = vmatpush.msra.mxu3 %v667_v27  ;;  %v1207_v15 = vld [vmem:[%s3064_s3 + $0x180] sm:$0xff]  ;;  %v1166_v18 = vld [vmem:[%s3064_s3 + $0x38] sm:$0xff]  ;;  %v1181_v47 = vld [vmem:[%s3064_s3 + $0xb0] sm:$0xff] }
 0x101   :  { %1298 = vmatpush.msra.mxu0 %v1204_v32  ;;  %1318 = vmatpush.msra.mxu1 %v1220_v19  ;;  %v1182_v27 = vld [vmem:[%s3064_s3 + $0xb8] sm:$0xff]  ;;  %v1164_v32 = vld [vmem:[%s3064_s3 + $0x28] sm:$0xff] }
 0x102   :  { %1087 = vmatpush.msra.mxu2 %v633_v20  ;;  %1107 = vmatpush.msra.mxu3 %v665_v23  ;;  %v1180_v19 = vld [vmem:[%s3064_s3 + $0xa8] sm:$0xff]  ;;  %v1163_v20 = vld [vmem:[%s3064_s3 + $0x20] sm:$0xff] }
 0x103   :  { %1299 = vmatpush.msra.mxu0 %v1203_v24  ;;  %1319 = vmatpush.msra.mxu1 %v1219_v25  ;;  %v1179_v23 = vld [vmem:[%s3064_s3 + $0xa0] sm:$0xff]  ;;  %v1162_v24 = vld [vmem:[%s3064_s3 + $0x18] sm:$0xff] }
 0x104   :  { %1088 = vmatpush.msra.mxu2 %v631_v28  ;;  %1108 = vmatpush.msra.mxu3 %v663_v2  ;;  %v1178_v25 = vld [vmem:[%s3064_s3 + $0x98] sm:$0xff]  ;;  %v1161_v28 = vld [vmem:[%s3064_s3 + $0x10] sm:$0xff] }
 0x105   :  { %1300 = vmatpush.msra.mxu0 %v1202_v31  ;;  %1320 = vmatpush.msra.mxu1 %v1218_v33  ;;  %v1177_v2 = vld [vmem:[%s3064_s3 + $0x90] sm:$0xff]  ;;  %v1160_v31 = vld [vmem:[%s3064_s3 + $0x8] sm:$0xff] }
 0x106   :  { %1089 = vmatpush.msra.mxu2 %v629_v34  ;;  %1109 = vmatpush.msra.mxu3 %v661_v37  ;;  %v1176_v33 = vld [vmem:[%s3064_s3 + $0x88] sm:$0xff]  ;;  %v1159_v34 = vld [vmem:[%s3064_s3] sm:$0xff] }
 0x107   :  { %1301 = vmatpush.msra.mxu0 %v1201_v38  ;;  %1321 = vmatpush.msra.mxu1 %v1217_v39  ;;  %v1175_v37 = vld [vmem:[%s3064_s3 + $0x80] sm:$0xff]  ;;  %v426_v39 = vmax.f32 %v2111_v29, 0.0  ;;  %v1236_v29 = vld [vmem:[%s3064_s3 + $0x268] sm:$0xff] }
 0x108   :  { %1090 = vmatpush.msra.mxu2 %v627_v41  ;;  %1110 = vmatpush.msra.mxu3 %v659_v42  ;;  %v2946_v38 = vld [vmem:[%s3063_s4 + $0x1] ss:$8 sm:$0x3]  ;;  %v427_v41 = vmax.f32 %v2113_v30, 0.0  ;;  %v1238_v42 = vld [vmem:[%s3064_s3 + $0x278] sm:$0xff] }
 0x109   :  { %1302 = vmatpush.msra.mxu0 %v1200_v43  ;;  %1322 = vmatpush.msra.mxu1 %v1216_v44  ;;  %v753_v43 = vperm.slane %v2946_v38, 0 }
 0x10a   :  { %1091 = vmatpush.msra.mxu2 %v625_v45  ;;  %1111 = vmatpush.msra.mxu3 %v657_v48  ;;  %v1237_v45 = vld [vmem:[%s3064_s3 + $0x270] sm:$0xff] }
 0x10b   :  { %1303 = vmatpush.msra.mxu0 %v1199_v49  ;;  %1323 = vmatpush.msra.mxu1 %v1215_v50  ;;  %v1235_v49 = vld [vmem:[%s3064_s3 + $0x260] sm:$0xff]  ;;  %v1234_v50 = vld [vmem:[%s3064_s3 + $0x258] sm:$0xff] }
 0x10c   :  { %1092 = vmatpush.msra.mxu2 %v623_v51  ;;  %1112 = vmatpush.msra.mxu3 %v655_v52  ;;  %v1233_v52 = vld [vmem:[%s3064_s3 + $0x250] sm:$0xff] }
 0x10d   :  { %1093 = vmatmul.f32.vlgmr.msra.gmra.mxu2 %v2231_v21  ;;  %1113 = vmatmul.f32.vlgmr.msra.gmra.mxu3 %v2233_v22  ;;  %v1213_v21 = vld [vmem:[%s3064_s3 + $0x1b0] sm:$0xff]  ;;  %v1172_v22 = vld [vmem:[%s3064_s3 + $0x68] sm:$0xff] }
 0x10e   :  { %1256 = vmatpush.msrb.mxu2 %v1174_v53  ;;  %1276 = vmatpush.msrb.mxu3 %v1190_v35  ;;  %v1232_v35 = vld [vmem:[%s3064_s3 + $0x248] sm:$0xff] }
 0x10f   :  { %1304 = vmatpush.msra.mxu0 %v1198_v36  ;;  %1324 = vmatpush.msra.mxu1 %v1214_v54  ;;  %v1231_v54 = vld [vmem:[%s3064_s3 + $0x240] sm:$0xff] }
 0x110   :  { %1257 = vmatpush.msrb.mxu2 %v1173_v55  ;;  %1277 = vmatpush.msrb.mxu3 %v1189_v56 }
 0x111   :  { %1305 = vmatpush.msra.mxu0 %v1197_v57  ;;  %1325 = vmatpush.msra.mxu1 %v1213_v21  ;;  %v1230_v57 = vld [vmem:[%s3064_s3 + $0x238] sm:$0xff] }
 0x112   :  { %1258 = vmatpush.msrb.mxu2 %v1172_v22  ;;  %1278 = vmatpush.msrb.mxu3 %v1188_v58  ;;  %v814_v53 = vpop.f32.mrf.mxu0  ;;  %v834_v55 = vpop.f32.mrf.mxu1  ;;  %v1229_v22 = vld [vmem:[%s3064_s3 + $0x230] sm:$0xff] }
 0x113   :  { %1306 = vmatpush.msra.mxu0 %v1196_v59  ;;  %1326 = vmatpush.msra.mxu1 %v1212_v60  ;;  %v1228_v60 = vld [vmem:[%s3064_s3 + $0x228] sm:$0xff] }
 0x114   :  { %1259 = vmatpush.msrb.mxu2 %v1171_v61  ;;  %1279 = vmatpush.msrb.mxu3 %v1187_v62  ;;  %v1227_v61 = vld [vmem:[%s3064_s3 + $0x220] sm:$0xff] }
 0x115   :  { %1307 = vmatpush.msra.mxu0 %v1195_v63  ;;  %1327 = vmatpush.msra.mxu1 %v1211_v0  ;;  %v1226_v63 = vld [vmem:[%s3064_s3 + $0x218] sm:$0xff] }
 0x116   :  { %1260 = vmatpush.msrb.mxu2 %v1170_v1  ;;  %1280 = vmatpush.msrb.mxu3 %v1186_v3  ;;  %v1225_v1 = vld [vmem:[%s3064_s3 + $0x210] sm:$0xff] }
 0x117   :  { %1308 = vmatpush.msra.mxu0 %v1194_v4  ;;  %1328 = vmatpush.msra.mxu1 %v1210_v5  ;;  %v1224_v4 = vld [vmem:[%s3064_s3 + $0x208] sm:$0xff] }
 0x118   :  { %1261 = vmatpush.msrb.mxu2 %v1169_v6  ;;  %1281 = vmatpush.msrb.mxu3 %v1185_v7  ;;  %v1223_v6 = vld [vmem:[%s3064_s3 + $0x200] sm:$0xff] }
 0x119   :  { %1309 = vmatpush.msra.mxu0 %v1193_v8  ;;  %1329 = vmatpush.msra.mxu1 %v1209_v9 }
 0x11a   :  { %1262 = vmatpush.msrb.mxu2 %v1168_v10  ;;  %1282 = vmatpush.msrb.mxu3 %v1184_v11 }
 0x11b   :  { %1310 = vmatpush.msra.mxu0 %v1192_v12  ;;  %1330 = vmatpush.msra.mxu1 %v1208_v40  ;;  %v1254_v40 = vld [vmem:[%s3064_s3 + $0x2f8] sm:$0xff] }
 0x11c   :  { %1263 = vmatpush.msrb.mxu2 %v1167_v26  ;;  %1283 = vmatpush.msrb.mxu3 %v1183_v13  ;;  %v1253_v26 = vld [vmem:[%s3064_s3 + $0x2f0] sm:$0xff]  ;;  %v1252_v13 = vld [vmem:[%s3064_s3 + $0x2e8] sm:$0xff] }
 0x11d   :  { %1311 = vmatpush.msra.mxu0 %v1191_v14  ;;  %1331 = vmatpush.msra.mxu1 %v1207_v15  ;;  %v1251_v14 = vld [vmem:[%s3064_s3 + $0x2e0] sm:$0xff]  ;;  %v1250_v15 = vld [vmem:[%s3064_s3 + $0x2d8] sm:$0xff] }
 0x11e   :  { %1312 = vmatmul.f32.vlgmr.msra.gmra.mxu0 %v428_v16  ;;  %1332 = vmatmul.f32.vlgmr.msra.gmra.mxu1 %v429_v17  ;;  %v1249_v16 = vld [vmem:[%s3064_s3 + $0x2d0] sm:$0xff]  ;;  %v1248_v17 = vld [vmem:[%s3064_s3 + $0x2c8] sm:$0xff] }
 0x11f   :  { %1264 = vmatpush.msrb.mxu2 %v1166_v18  ;;  %1284 = vmatpush.msrb.mxu3 %v1182_v27  ;;  %v1247_v18 = vld [vmem:[%s3064_s3 + $0x2c0] sm:$0xff]  ;;  %v1246_v27 = vld [vmem:[%s3064_s3 + $0x2b8] sm:$0xff] }
 0x121   :  { %1265 = vmatpush.msrb.mxu2 %v1165_v46  ;;  %1285 = vmatpush.msrb.mxu3 %v1181_v47  ;;  %v1245_v46 = vld [vmem:[%s3064_s3 + $0x2b0] sm:$0xff]  ;;  %v1244_v47 = vld [vmem:[%s3064_s3 + $0x2a8] sm:$0xff] }
 0x123   :  { %1266 = vmatpush.msrb.mxu2 %v1164_v32  ;;  %1286 = vmatpush.msrb.mxu3 %v1180_v19  ;;  %v1243_v32 = vld [vmem:[%s3064_s3 + $0x2a0] sm:$0xff]  ;;  %v1242_v19 = vld [vmem:[%s3064_s3 + $0x298] sm:$0xff] }
 0x125   :  { %1267 = vmatpush.msrb.mxu2 %v1163_v20  ;;  %1287 = vmatpush.msrb.mxu3 %v1179_v23  ;;  %v1241_v20 = vld [vmem:[%s3064_s3 + $0x290] sm:$0xff]  ;;  %v754_v23 = vperm.slane %v2946_v38, 1 }
 0x127   :  { %1268 = vmatpush.msrb.mxu2 %v1162_v24  ;;  %1288 = vmatpush.msrb.mxu3 %v1178_v25  ;;  %v1240_v24 = vld [vmem:[%s3064_s3 + $0x288] sm:$0xff] }
 0x128   :  { %v774_v44 = vpop.f32.mrf.mxu2  ;;  %v794_v48 = vpop.f32.mrf.mxu3 }
 0x129   :  { %1269 = vmatpush.msrb.mxu2 %v1161_v28  ;;  %1289 = vmatpush.msrb.mxu3 %v1177_v2  ;;  %v775_v30 = vadd.f32 %v774_v44, %v753_v43  ;;  %v1239_v28 = vld [vmem:[%s3064_s3 + $0x280] sm:$0xff] }
 0x12b   :  { %1270 = vmatpush.msrb.mxu2 %v1160_v31  ;;  %1290 = vmatpush.msrb.mxu3 %v1176_v33  ;;  %v795_v51 = vadd.f32 %v794_v48, %v775_v30  ;;  %v894_v0 = vpop.f32.mrf.mxu0  ;;  %v914_v5 = vpop.f32.mrf.mxu1 }
 0x12d   :  { %1271 = vmatpush.msrb.mxu2 %v1159_v34  ;;  %1291 = vmatpush.msrb.mxu3 %v1175_v37  ;;  %v815_v36 = vadd.f32 %v814_v53, %v795_v51 }
 0x12e   :  { %1272 = vmatmul.f32.vlgmr.msrb.gmra.mxu2 %v426_v39  ;;  %1292 = vmatmul.f32.vlgmr.msrb.gmra.mxu3 %v427_v41 }
 0x12f   :  { %1336 = vmatpush.msra.mxu2 %v1238_v42  ;;  %v835_v21 = vadd.f32 %v834_v55, %v815_v36  ;;  %1356 = vmatpush.msra.mxu3 %v1254_v40 }
 0x131   :  { %1337 = vmatpush.msra.mxu2 %v1237_v45  ;;  %1357 = vmatpush.msra.mxu3 %v1253_v26 }
 0x133   :  { %1338 = vmatpush.msra.mxu2 %v1236_v29  ;;  %1358 = vmatpush.msra.mxu3 %v1252_v13 }
 0x135   :  { %1339 = vmatpush.msra.mxu2 %v1235_v49  ;;  %1359 = vmatpush.msra.mxu3 %v1251_v14  ;;  %v974_v25 = vpop.f32.mrf.mxu0  ;;  %v994_v31 = vpop.f32.mrf.mxu1 }
 0x136   :  { %v854_v56 = vpop.f32.mrf.mxu2  ;;  %v975_v2 = vadd.f32 %v974_v25, %v754_v23 }
 0x137   :  { %1340 = vmatpush.msra.mxu2 %v1234_v50  ;;  %v855_v58 = vadd.f32 %v854_v56, %v835_v21  ;;  %1360 = vmatpush.msra.mxu3 %v1250_v15 }
 0x138   :  { %v874_v59 = vpop.f32.mrf.mxu3  ;;  %v995_v34 = vadd.f32 %v994_v31, %v975_v2 }
 0x139   :  { %1341 = vmatpush.msra.mxu2 %v1233_v52  ;;  %v875_v62 = vadd.f32 %v874_v59, %v855_v58  ;;  %1361 = vmatpush.msra.mxu3 %v1249_v16 }
 0x13b   :  { %1342 = vmatpush.msra.mxu2 %v1232_v35  ;;  %v895_v3 = vadd.f32 %v894_v0, %v875_v62  ;;  %1362 = vmatpush.msra.mxu3 %v1248_v17  ;;  %v1255_v35 = vld [vmem:[%s3063_s4 + $0x2] ss:$0 sm:$0xff] }
 0x13d   :  { %1343 = vmatpush.msra.mxu2 %v1231_v54  ;;  %v915_v7 = vadd.f32 %v914_v5, %v895_v3  ;;  %1363 = vmatpush.msra.mxu3 %v1247_v18  ;;  %v1381_v3 = vld [vmem:[%s3063_s4 + $0x4] ss:$0 sm:$0xff] }
 0x13f   :  { %1344 = vmatpush.msra.mxu2 %v1230_v57  ;;  %1364 = vmatpush.msra.mxu3 %v1246_v27 }
 0x141   :  { %1345 = vmatpush.msra.mxu2 %v1229_v22  ;;  %1365 = vmatpush.msra.mxu3 %v1245_v46 }
 0x143   :  { %1346 = vmatpush.msra.mxu2 %v1228_v60  ;;  %1366 = vmatpush.msra.mxu3 %v1244_v47 }
 0x145   :  { %1347 = vmatpush.msra.mxu2 %v1227_v61  ;;  %1367 = vmatpush.msra.mxu3 %v1243_v32 }
 0x147   :  { %1348 = vmatpush.msra.mxu2 %v1226_v63  ;;  %1368 = vmatpush.msra.mxu3 %v1242_v19  ;;  %v1377_v63 = vld [vmem:[%s3063_s4 + $0x3] ss:$0 sm:$0xff] }
 0x149   :  { %1349 = vmatpush.msra.mxu2 %v1225_v1  ;;  %1369 = vmatpush.msra.mxu3 %v1241_v20 }
 0x14b   :  { %1350 = vmatpush.msra.mxu2 %v1224_v4  ;;  %1370 = vmatpush.msra.mxu3 %v1240_v24 }
 0x14c   :  { %v934_v8 = vpop.f32.mrf.mxu2 }
 0x14d   :  { %v935_v9 = vadd.f32 %v934_v8, %v915_v7  ;;  %1351 = vmatpush.msra.mxu2 %v1223_v6  ;;  %1371 = vmatpush.msra.mxu3 %v1239_v28 }
 0x14e   :  { %v954_v10 = vpop.f32.mrf.mxu3 }
 0x14f   :  { %v955_v11 = vadd.f32 %v954_v10, %v935_v9 }
 0x151   :  { %v1157_v12 = vmax.f32 %v955_v11, 0.0 }
 0x153   :  { %1352 = vmatmul.f32.vlgmr.msra.gmra.mxu2 %v1157_v12 }
 0x157   :  { %v1054_v42 = vpop.f32.mrf.mxu0  ;;  %v1074_v43 = vpop.f32.mrf.mxu1 }
 0x16e   :  { %v1014_v33 = vpop.f32.mrf.mxu2  ;;  %v1034_v39 = vpop.f32.mrf.mxu3 }
 0x16f   :  { %v1015_v37 = vadd.f32 %v1014_v33, %v995_v34 }
 0x171   :  { %v1035_v41 = vadd.f32 %v1034_v39, %v1015_v37 }
 0x173   :  { %v1055_v38 = vadd.f32 %v1054_v42, %v1035_v41 }
 0x175   :  { %v1075_v44 = vadd.f32 %v1074_v43, %v1055_v38 }
 0x179   :  { %v1134_v49 = vpop.f32.mrf.mxu0  ;;  %v1154_v51 = vpop.f32.mrf.mxu1 }
 0x190   :  { %v1094_v45 = vpop.f32.mrf.mxu2  ;;  %v1114_v30 = vpop.f32.mrf.mxu3 }
 0x191   :  { %v1095_v29 = vadd.f32 %v1094_v45, %v1075_v44 }
 0x193   :  { %v1115_v48 = vadd.f32 %v1114_v30, %v1095_v29 }
 0x195   :  { %v1135_v50 = vadd.f32 %v1134_v49, %v1115_v48 }
 0x197   :  { %v1155_v52 = vadd.f32 %v1154_v51, %v1135_v50 }
 0x199   :  { %v1158_v53 = vmax.f32 %v1155_v52, 0.0 }
 0x19b   :  { %1372 = vmatmul.f32.vlgmr.msra.gmra.mxu3 %v1158_v53  ;;  %v1313_v57 = vpop.f32.mrf.mxu0  ;;  %v1333_v22 = vpop.f32.mrf.mxu1 }
 0x1b1   :  { %v1273_v36 = vpop.f32.mrf.mxu2  ;;  %v1293_v55 = vpop.f32.mrf.mxu3 }
 0x1b2   :  { %v1274_v54 = vadd.f32 %v1273_v36, %v1255_v35 }
 0x1b4   :  { %v1294_v56 = vadd.f32 %v1293_v55, %v1274_v54 }
 0x1b6   :  { %v1314_v21 = vadd.f32 %v1313_v57, %v1294_v56 }
 0x1b8   :  { %v1334_v59 = vadd.f32 %v1333_v22, %v1314_v21 }
 0x1d6   :  { %v1353_v58 = vpop.f32.mrf.mxu2 }
 0x1d7   :  { %v1354_v60 = vadd.f32 %v1353_v58, %v1334_v59 }
 0x21e   :  { %v1373_v61 = vpop.f32.mrf.mxu3 }
 0x21f   :  { %v1374_v62 = vadd.f32 %v1373_v61, %v1354_v60 }
 0x221   :  { %v1376_v0 = vmax.f32 %v1374_v62, 0.0 }
 0x223   :  { %v1378_v1 = vmul.f32 %v1377_v63, %v1376_v0 }
 0x225   :  { %1379 = vadd.xlane.f32.xlu0 %v1378_v1 }
 0x298   :  { %v1380_v4 = vpop.xlane.xlu0 %1379 }
 0x299   :  { %v1382_v5 = vadd.f32 %v1381_v3, %v1380_v4 }
 0x29b   :  { %1384 = vst.msk [vmem:[%s3065_s5] sm:$0xff] %vm1383_vm1, %v1382_v5 }

</bundles_post_ra>
